<compile_context>
chip_gen: v5e
topology: v5e:2x2
jax: 0.10.0
libtpu: 0.0.40
codegen_flags: <defaults>
</compile_context>

<pallas_src>
import functools

import jax
import jax.numpy as jnp
from jax import lax
from jax.experimental import pallas as pl
from jax.experimental.pallas import tpu as pltpu


# ---------------------------------------------------------------------------
# Fused Pallas kernel
# ---------------------------------------------------------------------------
def _unet_up_fused_kernel(x_ref, w1_ref, s1_ref, b1_ref,
                          w2_ref, s2_ref, b2_ref, wt_ref, st_ref, bt_ref,
                          o_ref, buf_ref, *, H, W):
    """Conv3x3+BN+ReLU -> Conv3x3+BN+ReLU -> ConvT2x2(stride2)+BN+ReLU.

    Layout: activations are (C, H*W) with H*W on the lane axis.

    x_ref:    (1, Cin, H*W)        f32
    w1_ref:   (9, F, Cin)          bf16 per-tap weights, tap index t = ky*3+kx
    w2_ref:   (9, F, F)            bf16
    wt_ref:   (4*Cout, F)          bf16, row = (dy*2+dx)*Cout + co
    s*/b*:    (rows, 1)            f32 folded BN scale / bias
    o_ref:    (1, 4*Cout, H*W)     f32
    buf_ref:  (max(Cin,F), H*W + 2*(W+1)) bf16 staging buffer with flattened
              zero halo -> every 3x3 tap is a plain shifted VMEM view.
    """
    HW = H * W
    HALO = W + 1                       # max |flattened tap offset|
    Cin = x_ref.shape[1]
    F = w1_ref.shape[1]

    # Column-edge validity masks, generated in-kernel (no input DMA).
    col = lax.broadcasted_iota(jnp.int32, (1, HW), 1) % W
    edge_l = col >= 1                  # valid where kx == 0 taps don't wrap
    edge_r = col <= W - 2              # valid where kx == 2 taps don't wrap

    # Zero ONLY the two halo strips; the interior is always overwritten before
    # it is read.  Done every grid step -> no cross-step state ("parallel" safe).
    zeros_halo = jnp.zeros((buf_ref.shape[0], HALO), buf_ref.dtype)
    buf_ref[:, :HALO] = zeros_halo
    buf_ref[:, HALO + HW:] = zeros_halo

    def conv3x3_bn_relu(c_in, w_ref_, s_ref_, b_ref_):
        # 9 small accumulated matmuls (K = c_in) on shifted bf16 views of the
        # staged activation; no im2col materialization / sublane concat.
        # Taps are grouped by kx so the column-edge fixup is two f32 selects
        # on the accumulated partial sums instead of six per-tap input masks.
        def acc_over_ky(kx):
            acc = None
            for ky in range(3):
                d = (ky - 1) * W + (kx - 1)
                tap = buf_ref[:c_in, HALO + d:HALO + d + HW]        # bf16 view
                p = jnp.dot(w_ref_[ky * 3 + kx], tap,
                            preferred_element_type=jnp.float32)     # (F, HW)
                acc = p if acc is None else acc + p
            return acc

        y = (acc_over_ky(1)
             + jnp.where(edge_l, acc_over_ky(0), 0.0)
             + jnp.where(edge_r, acc_over_ky(2), 0.0))
        return jnp.maximum(y * s_ref_[...] + b_ref_[...], 0.0)      # f32 (F, HW)

    # Stage input (bf16, matches reference rounding point), conv1.
    buf_ref[:Cin, HALO:HALO + HW] = x_ref[0].astype(jnp.bfloat16)
    a1 = conv3x3_bn_relu(Cin, w1_ref, s1_ref, b1_ref)               # (F, HW)

    # Stage conv1 output (bf16; never leaves VMEM), conv2.
    buf_ref[:F, HALO:HALO + HW] = a1.astype(jnp.bfloat16)
    a2 = conv3x3_bn_relu(F, w2_ref, s2_ref, b2_ref)                 # (F, HW)

    # ConvTranspose2d(2x2, stride=2): all four sub-pixel taps in one matmul.
    yt = jnp.dot(wt_ref[...], a2.astype(jnp.bfloat16),
                 preferred_element_type=jnp.float32)                # (4*Cout, HW)
    o_ref[0] = jnp.maximum(yt * st_ref[...] + bt_ref[...], 0.0)


# ---------------------------------------------------------------------------
# Wrapper: NCHW in -> NCHW out (PyTorch convention)
# ---------------------------------------------------------------------------
def unet_up_pallas(x_nchw, params):
    N, Cin, H, W = x_nchw.shape
    HW = H * W
    F = params["w1"].shape[-1]
    Cout = params["wt"].shape[-1]
    HALO = W + 1
    BUFW = HW + 2 * HALO
    R = max(Cin, F)

    # Free reshape: NCHW is already (C, H*W) contiguous per image.
    x_flat = x_nchw.reshape(N, Cin, HW)

    # Per-tap weight repack (tiny, done once in XLA):
    #   (kH, kW, Ci, Co) -> (9, Co, Ci), tap index t = ky*3 + kx.
    w1m = jnp.transpose(params["w1"], (0, 1, 3, 2)).reshape(
        9, F, Cin).astype(jnp.bfloat16)
    w2m = jnp.transpose(params["w2"], (0, 1, 3, 2)).reshape(
        9, F, F).astype(jnp.bfloat16)
    wtm = jnp.transpose(params["wt"], (0, 1, 3, 2)).reshape(
        4 * Cout, F).astype(jnp.bfloat16)                            # (4*Cout, F)

    def col_vec(v):
        return v.reshape(-1, 1).astype(jnp.float32)

    s1, b1 = col_vec(params["s1"]), col_vec(params["b1"])
    s2, b2 = col_vec(params["s2"]), col_vec(params["b2"])
    st = col_vec(jnp.tile(params["st"].reshape(1, Cout), (4, 1)))    # (4*Cout, 1)
    bt = col_vec(jnp.tile(params["bt"].reshape(1, Cout), (4, 1)))

    kernel = functools.partial(_unet_up_fused_kernel, H=H, W=W)

    out_flat = pl.pallas_call(
        kernel,
        out_shape=jax.ShapeDtypeStruct((N, 4 * Cout, HW), jnp.float32),
        grid=(N,),
        in_specs=[
            pl.BlockSpec((1, Cin, HW), lambda n: (n, 0, 0)),
            pl.BlockSpec((9, F, Cin), lambda n: (0, 0, 0)),
            pl.BlockSpec((F, 1), lambda n: (0, 0)),
            pl.BlockSpec((F, 1), lambda n: (0, 0)),
            pl.BlockSpec((9, F, F), lambda n: (0, 0, 0)),
            pl.BlockSpec((F, 1), lambda n: (0, 0)),
            pl.BlockSpec((F, 1), lambda n: (0, 0)),
            pl.BlockSpec((4 * Cout, F), lambda n: (0, 0)),
            pl.BlockSpec((4 * Cout, 1), lambda n: (0, 0)),
            pl.BlockSpec((4 * Cout, 1), lambda n: (0, 0)),
        ],
        out_specs=pl.BlockSpec((1, 4 * Cout, HW), lambda n: (n, 0, 0)),
        scratch_shapes=[pltpu.VMEM((R, BUFW), jnp.bfloat16)],
        compiler_params=pltpu.CompilerParams(
            dimension_semantics=("parallel",)),
    )(x_flat, w1m, s1, b1, w2m, s2, b2, wtm, st, bt)

    # De-interleave the stride-2 transposed-conv output (layout plumbing only):
    #   out_flat[n, (dy*2+dx)*Cout + co, i*W + j] -> out[n, co, 2i+dy, 2j+dx]
    out = out_flat.reshape(N, 2, 2, Cout, H, W)
    out = jnp.transpose(out, (0, 3, 4, 1, 5, 2)).reshape(N, Cout, 2 * H, 2 * W)
    return out


unet_up_forward = jax.jit(unet_up_pallas)


# ---------------------------------------------------------------------------
# Parameter construction (deterministic, synthetic) + folded eval-mode BN
# ---------------------------------------------------------------------------
_BN_EPS = 1e-5


def _fold_bn(conv_bias, gamma, beta, running_mean, running_var):
    scale = gamma / jnp.sqrt(running_var + _BN_EPS)
    bias = beta + (conv_bias - running_mean) * scale
    return scale, bias


def _bn_stats(key, c):
    k1, k2, k3, k4 = jax.random.split(key, 4)
    gamma = 1.0 + 0.1 * jax.random.normal(k1, (c,), jnp.float32)
    beta = 0.1 * jax.random.normal(k2, (c,), jnp.float32)
    mean = 0.1 * jax.random.normal(k3, (c,), jnp.float32)
    var = 1.0 + 0.2 * jax.random.uniform(k4, (c,), jnp.float32)
    return gamma, beta, mean, var


def make_params(key, in_channels, features, out_channels):
    k = jax.random.split(key, 9)
    p = {}

    w1 = 0.1 * jax.random.normal(k[0], (3, 3, in_channels, features), jnp.float32)
    b1 = 0.05 * jax.random.normal(k[1], (features,), jnp.float32)
    p["w1"] = w1
    p["s1"], p["b1"] = _fold_bn(b1, *_bn_stats(k[2], features))

    w2 = 0.1 * jax.random.normal(k[3], (3, 3, features, features), jnp.float32)
    b2 = 0.05 * jax.random.normal(k[4], (features,), jnp.float32)
    p["w2"] = w2
    p["s2"], p["b2"] = _fold_bn(b2, *_bn_stats(k[5], features))

    # ConvTranspose2d weight stored as (kH, kW, Cin=features, Cout).
    wt = 0.1 * jax.random.normal(k[6], (2, 2, features, out_channels), jnp.float32)
    bt = 0.05 * jax.random.normal(k[7], (out_channels,), jnp.float32)
    p["wt"] = wt
    p["st"], p["bt"] = _fold_bn(bt, *_bn_stats(k[8], out_channels))
    return p


# ---------------------------------------------------------------------------
# Pure-JAX reference (same bf16 rounding points as the kernel)
# ---------------------------------------------------------------------------
def unet_up_reference(x_nchw, params):
    x = jnp.transpose(x_nchw, (0, 2, 3, 1))  # NHWC

    def conv_bn_relu(x, w, s, b):
        y = lax.conv_general_dilated(
            x.astype(jnp.bfloat16), w.astype(jnp.bfloat16),
            window_strides=(1, 1), padding="SAME",
            dimension_numbers=("NHWC", "HWIO", "NHWC"),
            preferred_element_type=jnp.float32)
        return jnp.maximum(y * s + b, 0.0)

    x = conv_bn_relu(x, params["w1"], params["s1"], params["b1"])
    x = conv_bn_relu(x, params["w2"], params["s2"], params["b2"])

    wt, st, bt = params["wt"], params["st"], params["bt"]
    N, H, W, _ = x.shape
    Cout = wt.shape[-1]
    xb = x.astype(jnp.bfloat16)
    wtb = wt.astype(jnp.bfloat16)
    out = jnp.zeros((N, 2 * H, 2 * W, Cout), jnp.float32)
    for dy in range(2):
        for dx in range(2):
            y = jnp.einsum("nhwc,cd->nhwd", xb, wtb[dy, dx],
                           preferred_element_type=jnp.float32)
            out = out.at[:, dy::2, dx::2, :].set(y)
    out = jnp.maximum(out * st + bt, 0.0)
    return jnp.transpose(out, (0, 3, 1, 2))


if __name__ == "__main__":
    key = jax.random.PRNGKey(0)
    kx, kp = jax.random.split(key)

    # Small shapes: batch=2, in_channels=4, features=8, out_channels=4, 16x16
    N, Cin, H, W = 2, 4, 16, 16
    features, Cout = 8, 4

    x = jax.random.normal(kx, (N, Cin, H, W), jnp.float32)
    params = make_params(kp, Cin, features, Cout)

    out = unet_up_forward(x, params)
    out = jax.block_until_ready(out)

    ref = unet_up_reference(x, params)
    assert out.shape == (N, Cout, 2 * H, 2 * W), out.shape
    max_err = float(jnp.max(jnp.abs(out - ref)))
    assert jnp.allclose(out, ref, atol=2e-2, rtol=2e-2), max_err

    print("KERNEL_OK")
</pallas_src>

<mosaic_0001>
module attributes {stable_mosaic.version = 11 : i64} {
  func.func @_unet_up_fused_kernel(%arg0: i32, %arg1: memref<1x4x256xf32, #tpu.memory_space<vmem>>, %arg2: memref<9x8x4xbf16, #tpu.memory_space<vmem>>, %arg3: memref<8x1xf32, #tpu.memory_space<vmem>>, %arg4: memref<8x1xf32, #tpu.memory_space<vmem>>, %arg5: memref<9x8x8xbf16, #tpu.memory_space<vmem>>, %arg6: memref<8x1xf32, #tpu.memory_space<vmem>>, %arg7: memref<8x1xf32, #tpu.memory_space<vmem>>, %arg8: memref<16x8xbf16, #tpu.memory_space<vmem>>, %arg9: memref<16x1xf32, #tpu.memory_space<vmem>>, %arg10: memref<16x1xf32, #tpu.memory_space<vmem>>, %arg11: memref<1x16x256xf32, #tpu.memory_space<vmem>>, %arg12: memref<8x290xbf16, #tpu.memory_space<vmem>>) attributes {dimension_semantics = [#tpu.dimension_semantics<parallel>], iteration_bounds = array<i64: 2>, scalar_prefetch = 0 : i64, scratch_operands = 1 : i64, tpu.core_type = #tpu.core_type<tc>, window_params = [{transform_indices = @transform_0, window_bounds = array<i64: 1, 4, 256>}, {pipeline_mode = #tpu.pipeline_mode<synchronous>, transform_indices = @transform_1, window_bounds = array<i64: 9, 8, 4>}, {pipeline_mode = #tpu.pipeline_mode<synchronous>, transform_indices = @transform_2, window_bounds = array<i64: 8, 1>}, {pipeline_mode = #tpu.pipeline_mode<synchronous>, transform_indices = @transform_3, window_bounds = array<i64: 8, 1>}, {pipeline_mode = #tpu.pipeline_mode<synchronous>, transform_indices = @transform_4, window_bounds = array<i64: 9, 8, 8>}, {pipeline_mode = #tpu.pipeline_mode<synchronous>, transform_indices = @transform_5, window_bounds = array<i64: 8, 1>}, {pipeline_mode = #tpu.pipeline_mode<synchronous>, transform_indices = @transform_6, window_bounds = array<i64: 8, 1>}, {pipeline_mode = #tpu.pipeline_mode<synchronous>, transform_indices = @transform_7, window_bounds = array<i64: 16, 8>}, {pipeline_mode = #tpu.pipeline_mode<synchronous>, transform_indices = @transform_8, window_bounds = array<i64: 16, 1>}, {pipeline_mode = #tpu.pipeline_mode<synchronous>, transform_indices = @transform_9, window_bounds = array<i64: 16, 1>}, {transform_indices = @transform_10, window_bounds = array<i64: 1, 16, 256>}]} {
    %0 = tpu.iota {dimensions = array<i32: 1>} : vector<1x256xi32>
    %c16_i32 = arith.constant 16 : i32
    %c0_i32 = arith.constant 0 : i32
    %1 = arith.cmpi eq, %c16_i32, %c0_i32 : i32
    %c1_i32 = arith.constant 1 : i32
    %2 = arith.select %1, %c1_i32, %c16_i32 : i32
    %3 = vector.broadcast %2 : i32 to vector<1x256xi32>
    %4 = arith.remsi %0, %3 : vector<1x256xi32>
    %c0_i32_0 = arith.constant 0 : i32
    %5 = vector.broadcast %c0_i32_0 : i32 to vector<1x256xi32>
    %6 = arith.cmpi ne, %4, %5 : vector<1x256xi32>
    %c0_i32_1 = arith.constant 0 : i32
    %7 = vector.broadcast %c0_i32_1 : i32 to vector<1x256xi32>
    %8 = arith.cmpi slt, %4, %7 : vector<1x256xi32>
    %c0_i32_2 = arith.constant 0 : i32
    %9 = arith.cmpi slt, %2, %c0_i32_2 : i32
    %10 = vector.broadcast %9 : i1 to vector<1x256xi1>
    %11 = vector.broadcast %10 : vector<1x256xi1> to vector<1x256xi1>
    %12 = arith.xori %8, %11 : vector<1x256xi1>
    %13 = arith.andi %12, %6 : vector<1x256xi1>
    %14 = vector.broadcast %2 : i32 to vector<1x256xi32>
    %15 = arith.addi %4, %14 : vector<1x256xi32>
    %16 = arith.select %13, %15, %4 : vector<1x256xi1>, vector<1x256xi32>
    %c1_i32_3 = arith.constant 1 : i32
    %17 = vector.broadcast %c1_i32_3 : i32 to vector<1x256xi32>
    %18 = arith.cmpi sge, %16, %17 : vector<1x256xi32>
    %c14_i32 = arith.constant 14 : i32
    %19 = vector.broadcast %c14_i32 : i32 to vector<1x256xi32>
    %20 = arith.cmpi sle, %16, %19 : vector<1x256xi32>
    %cst = arith.constant 0.000000e+00 : bf16
    %21 = vector.broadcast %cst : bf16 to vector<8x17xbf16>
    %c0 = arith.constant 0 : index
    %c0_4 = arith.constant 0 : index
    %22 = vector.load %arg12[%c0, %c0_4] : memref<8x290xbf16, #tpu.memory_space<vmem>>, vector<8x17xbf16>
    tpu.vector_store %arg12[%c0, %c0_4], %21 {strides = array<i32>} : memref<8x290xbf16, #tpu.memory_space<vmem>>, vector<8x17xbf16>,
    %c0_5 = arith.constant 0 : index
    %c273 = arith.constant 273 : index
    %23 = vector.load %arg12[%c0_5, %c273] : memref<8x290xbf16, #tpu.memory_space<vmem>>, vector<8x17xbf16>
    tpu.vector_store %arg12[%c0_5, %c273], %21 {strides = array<i32>} : memref<8x290xbf16, #tpu.memory_space<vmem>>, vector<8x17xbf16>,
    %c0_6 = arith.constant 0 : index
    %c0_7 = arith.constant 0 : index
    %c0_8 = arith.constant 0 : index
    %24 = vector.load %arg1[%c0_6, %c0_7, %c0_8] : memref<1x4x256xf32, #tpu.memory_space<vmem>>, vector<1x4x256xf32>
    %25 = vector.shape_cast %24 : vector<1x4x256xf32> to vector<4x256xf32>
    %26 = arith.truncf %25 : vector<4x256xf32> to vector<4x256xbf16>
    %c0_9 = arith.constant 0 : index
    %c17 = arith.constant 17 : index
    %27 = vector.load %arg12[%c0_9, %c17] : memref<8x290xbf16, #tpu.memory_space<vmem>>, vector<4x256xbf16>
    tpu.vector_store %arg12[%c0_9, %c17], %26 {strides = array<i32>} : memref<8x290xbf16, #tpu.memory_space<vmem>>, vector<4x256xbf16>,
    %c0_10 = arith.constant 0 : index
    %c1 = arith.constant 1 : index
    %28 = vector.load %arg12[%c0_10, %c1] : memref<8x290xbf16, #tpu.memory_space<vmem>>, vector<4x256xbf16>
    %c1_11 = arith.constant 1 : index
    %c0_12 = arith.constant 0 : index
    %c0_13 = arith.constant 0 : index
    %29 = vector.load %arg2[%c1_11, %c0_12, %c0_13] : memref<9x8x4xbf16, #tpu.memory_space<vmem>>, vector<1x8x4xbf16>
    %30 = vector.shape_cast %29 : vector<1x8x4xbf16> to vector<8x4xbf16>
    %cst_14 = arith.constant dense<0.000000e+00> : vector<8x256xf32>
    %31 = tpu.matmul %30, %28, %cst_14 {dimension_numbers = #tpu.dot_dimension_numbers<[1], [0], [0], [1], [0, 0, 1, 1], [], []>} : vector<8x4xbf16>, vector<4x256xbf16>, vector<8x256xf32> -> vector<8x256xf32>
    %c0_15 = arith.constant 0 : index
    %c17_16 = arith.constant 17 : index
    %32 = vector.load %arg12[%c0_15, %c17_16] : memref<8x290xbf16, #tpu.memory_space<vmem>>, vector<4x256xbf16>
    %c4 = arith.constant 4 : index
    %c0_17 = arith.constant 0 : index
    %c0_18 = arith.constant 0 : index
    %33 = vector.load %arg2[%c4, %c0_17, %c0_18] : memref<9x8x4xbf16, #tpu.memory_space<vmem>>, vector<1x8x4xbf16>
    %34 = vector.shape_cast %33 : vector<1x8x4xbf16> to vector<8x4xbf16>
    %cst_19 = arith.constant dense<0.000000e+00> : vector<8x256xf32>
    %35 = tpu.matmul %34, %32, %cst_19 {dimension_numbers = #tpu.dot_dimension_numbers<[1], [0], [0], [1], [0, 0, 1, 1], [], []>} : vector<8x4xbf16>, vector<4x256xbf16>, vector<8x256xf32> -> vector<8x256xf32>
    %36 = arith.addf %31, %35 : vector<8x256xf32>
    %c0_20 = arith.constant 0 : index
    %c33 = arith.constant 33 : index
    %37 = vector.load %arg12[%c0_20, %c33] : memref<8x290xbf16, #tpu.memory_space<vmem>>, vector<4x256xbf16>
    %c7 = arith.constant 7 : index
    %c0_21 = arith.constant 0 : index
    %c0_22 = arith.constant 0 : index
    %38 = vector.load %arg2[%c7, %c0_21, %c0_22] : memref<9x8x4xbf16, #tpu.memory_space<vmem>>, vector<1x8x4xbf16>
    %39 = vector.shape_cast %38 : vector<1x8x4xbf16> to vector<8x4xbf16>
    %cst_23 = arith.constant dense<0.000000e+00> : vector<8x256xf32>
    %40 = tpu.matmul %39, %37, %cst_23 {dimension_numbers = #tpu.dot_dimension_numbers<[1], [0], [0], [1], [0, 0, 1, 1], [], []>} : vector<8x4xbf16>, vector<4x256xbf16>, vector<8x256xf32> -> vector<8x256xf32>
    %41 = arith.addf %36, %40 : vector<8x256xf32>
    %c0_24 = arith.constant 0 : index
    %c0_25 = arith.constant 0 : index
    %42 = vector.load %arg12[%c0_24, %c0_25] : memref<8x290xbf16, #tpu.memory_space<vmem>>, vector<4x256xbf16>
    %c0_26 = arith.constant 0 : index
    %c0_27 = arith.constant 0 : index
    %c0_28 = arith.constant 0 : index
    %43 = vector.load %arg2[%c0_26, %c0_27, %c0_28] : memref<9x8x4xbf16, #tpu.memory_space<vmem>>, vector<1x8x4xbf16>
    %44 = vector.shape_cast %43 : vector<1x8x4xbf16> to vector<8x4xbf16>
    %cst_29 = arith.constant dense<0.000000e+00> : vector<8x256xf32>
    %45 = tpu.matmul %44, %42, %cst_29 {dimension_numbers = #tpu.dot_dimension_numbers<[1], [0], [0], [1], [0, 0, 1, 1], [], []>} : vector<8x4xbf16>, vector<4x256xbf16>, vector<8x256xf32> -> vector<8x256xf32>
    %c0_30 = arith.constant 0 : index
    %c16 = arith.constant 16 : index
    %46 = vector.load %arg12[%c0_30, %c16] : memref<8x290xbf16, #tpu.memory_space<vmem>>, vector<4x256xbf16>
    %c3 = arith.constant 3 : index
    %c0_31 = arith.constant 0 : index
    %c0_32 = arith.constant 0 : index
    %47 = vector.load %arg2[%c3, %c0_31, %c0_32] : memref<9x8x4xbf16, #tpu.memory_space<vmem>>, vector<1x8x4xbf16>
    %48 = vector.shape_cast %47 : vector<1x8x4xbf16> to vector<8x4xbf16>
    %cst_33 = arith.constant dense<0.000000e+00> : vector<8x256xf32>
    %49 = tpu.matmul %48, %46, %cst_33 {dimension_numbers = #tpu.dot_dimension_numbers<[1], [0], [0], [1], [0, 0, 1, 1], [], []>} : vector<8x4xbf16>, vector<4x256xbf16>, vector<8x256xf32> -> vector<8x256xf32>
    %50 = arith.addf %45, %49 : vector<8x256xf32>
    %c0_34 = arith.constant 0 : index
    %c32 = arith.constant 32 : index
    %51 = vector.load %arg12[%c0_34, %c32] : memref<8x290xbf16, #tpu.memory_space<vmem>>, vector<4x256xbf16>
    %c6 = arith.constant 6 : index
    %c0_35 = arith.constant 0 : index
    %c0_36 = arith.constant 0 : index
    %52 = vector.load %arg2[%c6, %c0_35, %c0_36] : memref<9x8x4xbf16, #tpu.memory_space<vmem>>, vector<1x8x4xbf16>
    %53 = vector.shape_cast %52 : vector<1x8x4xbf16> to vector<8x4xbf16>
    %cst_37 = arith.constant dense<0.000000e+00> : vector<8x256xf32>
    %54 = tpu.matmul %53, %51, %cst_37 {dimension_numbers = #tpu.dot_dimension_numbers<[1], [0], [0], [1], [0, 0, 1, 1], [], []>} : vector<8x4xbf16>, vector<4x256xbf16>, vector<8x256xf32> -> vector<8x256xf32>
    %55 = arith.addf %50, %54 : vector<8x256xf32>
    %cst_38 = arith.constant 0.000000e+00 : f32
    %56 = vector.shape_cast %18 : vector<1x256xi1> to vector<1x256xi1>
    %57 = vector.broadcast %56 : vector<1x256xi1> to vector<8x256xi1>
    %58 = vector.broadcast %cst_38 : f32 to vector<8x256xf32>
    %59 = arith.select %57, %55, %58 : vector<8x256xi1>, vector<8x256xf32>
    %60 = arith.addf %41, %59 : vector<8x256xf32>
    %c0_39 = arith.constant 0 : index
    %c2 = arith.constant 2 : index
    %61 = vector.load %arg12[%c0_39, %c2] : memref<8x290xbf16, #tpu.memory_space<vmem>>, vector<4x256xbf16>
    %c2_40 = arith.constant 2 : index
    %c0_41 = arith.constant 0 : index
    %c0_42 = arith.constant 0 : index
    %62 = vector.load %arg2[%c2_40, %c0_41, %c0_42] : memref<9x8x4xbf16, #tpu.memory_space<vmem>>, vector<1x8x4xbf16>
    %63 = vector.shape_cast %62 : vector<1x8x4xbf16> to vector<8x4xbf16>
    %cst_43 = arith.constant dense<0.000000e+00> : vector<8x256xf32>
    %64 = tpu.matmul %63, %61, %cst_43 {dimension_numbers = #tpu.dot_dimension_numbers<[1], [0], [0], [1], [0, 0, 1, 1], [], []>} : vector<8x4xbf16>, vector<4x256xbf16>, vector<8x256xf32> -> vector<8x256xf32>
    %c0_44 = arith.constant 0 : index
    %c18 = arith.constant 18 : index
    %65 = vector.load %arg12[%c0_44, %c18] : memref<8x290xbf16, #tpu.memory_space<vmem>>, vector<4x256xbf16>
    %c5 = arith.constant 5 : index
    %c0_45 = arith.constant 0 : index
    %c0_46 = arith.constant 0 : index
    %66 = vector.load %arg2[%c5, %c0_45, %c0_46] : memref<9x8x4xbf16, #tpu.memory_space<vmem>>, vector<1x8x4xbf16>
    %67 = vector.shape_cast %66 : vector<1x8x4xbf16> to vector<8x4xbf16>
    %cst_47 = arith.constant dense<0.000000e+00> : vector<8x256xf32>
    %68 = tpu.matmul %67, %65, %cst_47 {dimension_numbers = #tpu.dot_dimension_numbers<[1], [0], [0], [1], [0, 0, 1, 1], [], []>} : vector<8x4xbf16>, vector<4x256xbf16>, vector<8x256xf32> -> vector<8x256xf32>
    %69 = arith.addf %64, %68 : vector<8x256xf32>
    %c0_48 = arith.constant 0 : index
    %c34 = arith.constant 34 : index
    %70 = vector.load %arg12[%c0_48, %c34] : memref<8x290xbf16, #tpu.memory_space<vmem>>, vector<4x256xbf16>
    %c8 = arith.constant 8 : index
    %c0_49 = arith.constant 0 : index
    %c0_50 = arith.constant 0 : index
    %71 = vector.load %arg2[%c8, %c0_49, %c0_50] : memref<9x8x4xbf16, #tpu.memory_space<vmem>>, vector<1x8x4xbf16>
    %72 = vector.shape_cast %71 : vector<1x8x4xbf16> to vector<8x4xbf16>
    %cst_51 = arith.constant dense<0.000000e+00> : vector<8x256xf32>
    %73 = tpu.matmul %72, %70, %cst_51 {dimension_numbers = #tpu.dot_dimension_numbers<[1], [0], [0], [1], [0, 0, 1, 1], [], []>} : vector<8x4xbf16>, vector<4x256xbf16>, vector<8x256xf32> -> vector<8x256xf32>
    %74 = arith.addf %69, %73 : vector<8x256xf32>
    %cst_52 = arith.constant 0.000000e+00 : f32
    %75 = vector.shape_cast %20 : vector<1x256xi1> to vector<1x256xi1>
    %76 = vector.broadcast %75 : vector<1x256xi1> to vector<8x256xi1>
    %77 = vector.broadcast %cst_52 : f32 to vector<8x256xf32>
    %78 = arith.select %76, %74, %77 : vector<8x256xi1>, vector<8x256xf32>
    %79 = arith.addf %60, %78 : vector<8x256xf32>
    %c0_53 = arith.constant 0 : index
    %c0_54 = arith.constant 0 : index
    %80 = vector.load %arg3[%c0_53, %c0_54] : memref<8x1xf32, #tpu.memory_space<vmem>>, vector<8x1xf32>
    %81 = vector.broadcast %80 : vector<8x1xf32> to vector<8x256xf32>
    %82 = arith.mulf %79, %81 : vector<8x256xf32>
    %c0_55 = arith.constant 0 : index
    %c0_56 = arith.constant 0 : index
    %83 = vector.load %arg4[%c0_55, %c0_56] : memref<8x1xf32, #tpu.memory_space<vmem>>, vector<8x1xf32>
    %84 = vector.broadcast %83 : vector<8x1xf32> to vector<8x256xf32>
    %85 = arith.addf %82, %84 : vector<8x256xf32>
    %cst_57 = arith.constant 0.000000e+00 : f32
    %86 = vector.broadcast %cst_57 : f32 to vector<8x256xf32>
    %87 = arith.maximumf %85, %86 : vector<8x256xf32>
    %88 = arith.truncf %87 : vector<8x256xf32> to vector<8x256xbf16>
    %c0_58 = arith.constant 0 : index
    %c17_59 = arith.constant 17 : index
    %89 = vector.load %arg12[%c0_58, %c17_59] : memref<8x290xbf16, #tpu.memory_space<vmem>>, vector<8x256xbf16>
    tpu.vector_store %arg12[%c0_58, %c17_59], %88 {strides = array<i32>} : memref<8x290xbf16, #tpu.memory_space<vmem>>, vector<8x256xbf16>,
    %c0_60 = arith.constant 0 : index
    %c1_61 = arith.constant 1 : index
    %90 = vector.load %arg12[%c0_60, %c1_61] : memref<8x290xbf16, #tpu.memory_space<vmem>>, vector<8x256xbf16>
    %c1_62 = arith.constant 1 : index
    %c0_63 = arith.constant 0 : index
    %c0_64 = arith.constant 0 : index
    %91 = vector.load %arg5[%c1_62, %c0_63, %c0_64] : memref<9x8x8xbf16, #tpu.memory_space<vmem>>, vector<1x8x8xbf16>
    %92 = vector.shape_cast %91 : vector<1x8x8xbf16> to vector<8x8xbf16>
    %cst_65 = arith.constant dense<0.000000e+00> : vector<8x256xf32>
    %93 = tpu.matmul %92, %90, %cst_65 {dimension_numbers = #tpu.dot_dimension_numbers<[1], [0], [0], [1], [0, 0, 1, 1], [], []>} : vector<8x8xbf16>, vector<8x256xbf16>, vector<8x256xf32> -> vector<8x256xf32>
    %c0_66 = arith.constant 0 : index
    %c17_67 = arith.constant 17 : index
    %94 = vector.load %arg12[%c0_66, %c17_67] : memref<8x290xbf16, #tpu.memory_space<vmem>>, vector<8x256xbf16>
    %c4_68 = arith.constant 4 : index
    %c0_69 = arith.constant 0 : index
    %c0_70 = arith.constant 0 : index
    %95 = vector.load %arg5[%c4_68, %c0_69, %c0_70] : memref<9x8x8xbf16, #tpu.memory_space<vmem>>, vector<1x8x8xbf16>
    %96 = vector.shape_cast %95 : vector<1x8x8xbf16> to vector<8x8xbf16>
    %cst_71 = arith.constant dense<0.000000e+00> : vector<8x256xf32>
    %97 = tpu.matmul %96, %94, %cst_71 {dimension_numbers = #tpu.dot_dimension_numbers<[1], [0], [0], [1], [0, 0, 1, 1], [], []>} : vector<8x8xbf16>, vector<8x256xbf16>, vector<8x256xf32> -> vector<8x256xf32>
    %98 = arith.addf %93, %97 : vector<8x256xf32>
    %c0_72 = arith.constant 0 : index
    %c33_73 = arith.constant 33 : index
    %99 = vector.load %arg12[%c0_72, %c33_73] : memref<8x290xbf16, #tpu.memory_space<vmem>>, vector<8x256xbf16>
    %c7_74 = arith.constant 7 : index
    %c0_75 = arith.constant 0 : index
    %c0_76 = arith.constant 0 : index
    %100 = vector.load %arg5[%c7_74, %c0_75, %c0_76] : memref<9x8x8xbf16, #tpu.memory_space<vmem>>, vector<1x8x8xbf16>
    %101 = vector.shape_cast %100 : vector<1x8x8xbf16> to vector<8x8xbf16>
    %cst_77 = arith.constant dense<0.000000e+00> : vector<8x256xf32>
    %102 = tpu.matmul %101, %99, %cst_77 {dimension_numbers = #tpu.dot_dimension_numbers<[1], [0], [0], [1], [0, 0, 1, 1], [], []>} : vector<8x8xbf16>, vector<8x256xbf16>, vector<8x256xf32> -> vector<8x256xf32>
    %103 = arith.addf %98, %102 : vector<8x256xf32>
    %c0_78 = arith.constant 0 : index
    %c0_79 = arith.constant 0 : index
    %104 = vector.load %arg12[%c0_78, %c0_79] : memref<8x290xbf16, #tpu.memory_space<vmem>>, vector<8x256xbf16>
    %c0_80 = arith.constant 0 : index
    %c0_81 = arith.constant 0 : index
    %c0_82 = arith.constant 0 : index
    %105 = vector.load %arg5[%c0_80, %c0_81, %c0_82] : memref<9x8x8xbf16, #tpu.memory_space<vmem>>, vector<1x8x8xbf16>
    %106 = vector.shape_cast %105 : vector<1x8x8xbf16> to vector<8x8xbf16>
    %cst_83 = arith.constant dense<0.000000e+00> : vector<8x256xf32>
    %107 = tpu.matmul %106, %104, %cst_83 {dimension_numbers = #tpu.dot_dimension_numbers<[1], [0], [0], [1], [0, 0, 1, 1], [], []>} : vector<8x8xbf16>, vector<8x256xbf16>, vector<8x256xf32> -> vector<8x256xf32>
    %c0_84 = arith.constant 0 : index
    %c16_85 = arith.constant 16 : index
    %108 = vector.load %arg12[%c0_84, %c16_85] : memref<8x290xbf16, #tpu.memory_space<vmem>>, vector<8x256xbf16>
    %c3_86 = arith.constant 3 : index
    %c0_87 = arith.constant 0 : index
    %c0_88 = arith.constant 0 : index
    %109 = vector.load %arg5[%c3_86, %c0_87, %c0_88] : memref<9x8x8xbf16, #tpu.memory_space<vmem>>, vector<1x8x8xbf16>
    %110 = vector.shape_cast %109 : vector<1x8x8xbf16> to vector<8x8xbf16>
    %cst_89 = arith.constant dense<0.000000e+00> : vector<8x256xf32>
    %111 = tpu.matmul %110, %108, %cst_89 {dimension_numbers = #tpu.dot_dimension_numbers<[1], [0], [0], [1], [0, 0, 1, 1], [], []>} : vector<8x8xbf16>, vector<8x256xbf16>, vector<8x256xf32> -> vector<8x256xf32>
    %112 = arith.addf %107, %111 : vector<8x256xf32>
    %c0_90 = arith.constant 0 : index
    %c32_91 = arith.constant 32 : index
    %113 = vector.load %arg12[%c0_90, %c32_91] : memref<8x290xbf16, #tpu.memory_space<vmem>>, vector<8x256xbf16>
    %c6_92 = arith.constant 6 : index
    %c0_93 = arith.constant 0 : index
    %c0_94 = arith.constant 0 : index
    %114 = vector.load %arg5[%c6_92, %c0_93, %c0_94] : memref<9x8x8xbf16, #tpu.memory_space<vmem>>, vector<1x8x8xbf16>
    %115 = vector.shape_cast %114 : vector<1x8x8xbf16> to vector<8x8xbf16>
    %cst_95 = arith.constant dense<0.000000e+00> : vector<8x256xf32>
    %116 = tpu.matmul %115, %113, %cst_95 {dimension_numbers = #tpu.dot_dimension_numbers<[1], [0], [0], [1], [0, 0, 1, 1], [], []>} : vector<8x8xbf16>, vector<8x256xbf16>, vector<8x256xf32> -> vector<8x256xf32>
    %117 = arith.addf %112, %116 : vector<8x256xf32>
    %cst_96 = arith.constant 0.000000e+00 : f32
    %118 = vector.shape_cast %18 : vector<1x256xi1> to vector<1x256xi1>
    %119 = vector.broadcast %118 : vector<1x256xi1> to vector<8x256xi1>
    %120 = vector.broadcast %cst_96 : f32 to vector<8x256xf32>
    %121 = arith.select %119, %117, %120 : vector<8x256xi1>, vector<8x256xf32>
    %122 = arith.addf %103, %121 : vector<8x256xf32>
    %c0_97 = arith.constant 0 : index
    %c2_98 = arith.constant 2 : index
    %123 = vector.load %arg12[%c0_97, %c2_98] : memref<8x290xbf16, #tpu.memory_space<vmem>>, vector<8x256xbf16>
    %c2_99 = arith.constant 2 : index
    %c0_100 = arith.constant 0 : index
    %c0_101 = arith.constant 0 : index
    %124 = vector.load %arg5[%c2_99, %c0_100, %c0_101] : memref<9x8x8xbf16, #tpu.memory_space<vmem>>, vector<1x8x8xbf16>
    %125 = vector.shape_cast %124 : vector<1x8x8xbf16> to vector<8x8xbf16>
    %cst_102 = arith.constant dense<0.000000e+00> : vector<8x256xf32>
    %126 = tpu.matmul %125, %123, %cst_102 {dimension_numbers = #tpu.dot_dimension_numbers<[1], [0], [0], [1], [0, 0, 1, 1], [], []>} : vector<8x8xbf16>, vector<8x256xbf16>, vector<8x256xf32> -> vector<8x256xf32>
    %c0_103 = arith.constant 0 : index
    %c18_104 = arith.constant 18 : index
    %127 = vector.load %arg12[%c0_103, %c18_104] : memref<8x290xbf16, #tpu.memory_space<vmem>>, vector<8x256xbf16>
    %c5_105 = arith.constant 5 : index
    %c0_106 = arith.constant 0 : index
    %c0_107 = arith.constant 0 : index
    %128 = vector.load %arg5[%c5_105, %c0_106, %c0_107] : memref<9x8x8xbf16, #tpu.memory_space<vmem>>, vector<1x8x8xbf16>
    %129 = vector.shape_cast %128 : vector<1x8x8xbf16> to vector<8x8xbf16>
    %cst_108 = arith.constant dense<0.000000e+00> : vector<8x256xf32>
    %130 = tpu.matmul %129, %127, %cst_108 {dimension_numbers = #tpu.dot_dimension_numbers<[1], [0], [0], [1], [0, 0, 1, 1], [], []>} : vector<8x8xbf16>, vector<8x256xbf16>, vector<8x256xf32> -> vector<8x256xf32>
    %131 = arith.addf %126, %130 : vector<8x256xf32>
    %c0_109 = arith.constant 0 : index
    %c34_110 = arith.constant 34 : index
    %132 = vector.load %arg12[%c0_109, %c34_110] : memref<8x290xbf16, #tpu.memory_space<vmem>>, vector<8x256xbf16>
    %c8_111 = arith.constant 8 : index
    %c0_112 = arith.constant 0 : index
    %c0_113 = arith.constant 0 : index
    %133 = vector.load %arg5[%c8_111, %c0_112, %c0_113] : memref<9x8x8xbf16, #tpu.memory_space<vmem>>, vector<1x8x8xbf16>
    %134 = vector.shape_cast %133 : vector<1x8x8xbf16> to vector<8x8xbf16>
    %cst_114 = arith.constant dense<0.000000e+00> : vector<8x256xf32>
    %135 = tpu.matmul %134, %132, %cst_114 {dimension_numbers = #tpu.dot_dimension_numbers<[1], [0], [0], [1], [0, 0, 1, 1], [], []>} : vector<8x8xbf16>, vector<8x256xbf16>, vector<8x256xf32> -> vector<8x256xf32>
    %136 = arith.addf %131, %135 : vector<8x256xf32>
    %cst_115 = arith.constant 0.000000e+00 : f32
    %137 = vector.shape_cast %20 : vector<1x256xi1> to vector<1x256xi1>
    %138 = vector.broadcast %137 : vector<1x256xi1> to vector<8x256xi1>
    %139 = vector.broadcast %cst_115 : f32 to vector<8x256xf32>
    %140 = arith.select %138, %136, %139 : vector<8x256xi1>, vector<8x256xf32>
    %141 = arith.addf %122, %140 : vector<8x256xf32>
    %c0_116 = arith.constant 0 : index
    %c0_117 = arith.constant 0 : index
    %142 = vector.load %arg6[%c0_116, %c0_117] : memref<8x1xf32, #tpu.memory_space<vmem>>, vector<8x1xf32>
    %143 = vector.broadcast %142 : vector<8x1xf32> to vector<8x256xf32>
    %144 = arith.mulf %141, %143 : vector<8x256xf32>
    %c0_118 = arith.constant 0 : index
    %c0_119 = arith.constant 0 : index
    %145 = vector.load %arg7[%c0_118, %c0_119] : memref<8x1xf32, #tpu.memory_space<vmem>>, vector<8x1xf32>
    %146 = vector.broadcast %145 : vector<8x1xf32> to vector<8x256xf32>
    %147 = arith.addf %144, %146 : vector<8x256xf32>
    %cst_120 = arith.constant 0.000000e+00 : f32
    %148 = vector.broadcast %cst_120 : f32 to vector<8x256xf32>
    %149 = arith.maximumf %147, %148 : vector<8x256xf32>
    %c0_121 = arith.constant 0 : index
    %c0_122 = arith.constant 0 : index
    %150 = vector.load %arg8[%c0_121, %c0_122] : memref<16x8xbf16, #tpu.memory_space<vmem>>, vector<16x8xbf16>
    %151 = arith.truncf %149 : vector<8x256xf32> to vector<8x256xbf16>
    %cst_123 = arith.constant dense<0.000000e+00> : vector<16x256xf32>
    %152 = tpu.matmul %150, %151, %cst_123 {dimension_numbers = #tpu.dot_dimension_numbers<[1], [0], [0], [1], [0, 0, 1, 1], [], []>} : vector<16x8xbf16>, vector<8x256xbf16>, vector<16x256xf32> -> vector<16x256xf32>
    %c0_124 = arith.constant 0 : index
    %c0_125 = arith.constant 0 : index
    %153 = vector.load %arg9[%c0_124, %c0_125] : memref<16x1xf32, #tpu.memory_space<vmem>>, vector<16x1xf32>
    %154 = vector.broadcast %153 : vector<16x1xf32> to vector<16x256xf32>
    %155 = arith.mulf %152, %154 : vector<16x256xf32>
    %c0_126 = arith.constant 0 : index
    %c0_127 = arith.constant 0 : index
    %156 = vector.load %arg10[%c0_126, %c0_127] : memref<16x1xf32, #tpu.memory_space<vmem>>, vector<16x1xf32>
    %157 = vector.broadcast %156 : vector<16x1xf32> to vector<16x256xf32>
    %158 = arith.addf %155, %157 : vector<16x256xf32>
    %cst_128 = arith.constant 0.000000e+00 : f32
    %159 = vector.broadcast %cst_128 : f32 to vector<16x256xf32>
    %160 = arith.maximumf %158, %159 : vector<16x256xf32>
    %c0_129 = arith.constant 0 : index
    %c0_130 = arith.constant 0 : index
    %c0_131 = arith.constant 0 : index
    %161 = vector.load %arg11[%c0_129, %c0_130, %c0_131] : memref<1x16x256xf32, #tpu.memory_space<vmem>>, vector<1x16x256xf32>
    %162 = vector.shape_cast %161 : vector<1x16x256xf32> to vector<16x256xf32>
    %163 = vector.shape_cast %160 : vector<16x256xf32> to vector<1x16x256xf32>
    tpu.vector_store %arg11[%c0_129, %c0_130, %c0_131], %163 {strides = array<i32>} : memref<1x16x256xf32, #tpu.memory_space<vmem>>, vector<1x16x256xf32>,
    return
  }
  func.func @transform_0(%arg0: i32) -> (i32, i32, i32) {
    %c0_i32 = arith.constant 0 : i32
    %c0_i32_0 = arith.constant 0 : i32
    %c0_i32_1 = arith.constant 0 : i32
    return %arg0, %c0_i32, %c0_i32_0 : i32, i32, i32
  }
  func.func @transform_1(%arg0: i32) -> (i32, i32, i32) {
    %c0_i32 = arith.constant 0 : i32
    %c0_i32_0 = arith.constant 0 : i32
    %c0_i32_1 = arith.constant 0 : i32
    %c0_i32_2 = arith.constant 0 : i32
    return %c0_i32, %c0_i32_0, %c0_i32_1 : i32, i32, i32
  }
  func.func @transform_2(%arg0: i32) -> (i32, i32) {
    %c0_i32 = arith.constant 0 : i32
    %c0_i32_0 = arith.constant 0 : i32
    %c0_i32_1 = arith.constant 0 : i32
    return %c0_i32, %c0_i32_0 : i32, i32
  }
  func.func @transform_3(%arg0: i32) -> (i32, i32) {
    %c0_i32 = arith.constant 0 : i32
    %c0_i32_0 = arith.constant 0 : i32
    %c0_i32_1 = arith.constant 0 : i32
    return %c0_i32, %c0_i32_0 : i32, i32
  }
  func.func @transform_4(%arg0: i32) -> (i32, i32, i32) {
    %c0_i32 = arith.constant 0 : i32
    %c0_i32_0 = arith.constant 0 : i32
    %c0_i32_1 = arith.constant 0 : i32
    %c0_i32_2 = arith.constant 0 : i32
    return %c0_i32, %c0_i32_0, %c0_i32_1 : i32, i32, i32
  }
  func.func @transform_5(%arg0: i32) -> (i32, i32) {
    %c0_i32 = arith.constant 0 : i32
    %c0_i32_0 = arith.constant 0 : i32
    %c0_i32_1 = arith.constant 0 : i32
    return %c0_i32, %c0_i32_0 : i32, i32
  }
  func.func @transform_6(%arg0: i32) -> (i32, i32) {
    %c0_i32 = arith.constant 0 : i32
    %c0_i32_0 = arith.constant 0 : i32
    %c0_i32_1 = arith.constant 0 : i32
    return %c0_i32, %c0_i32_0 : i32, i32
  }
  func.func @transform_7(%arg0: i32) -> (i32, i32) {
    %c0_i32 = arith.constant 0 : i32
    %c0_i32_0 = arith.constant 0 : i32
    %c0_i32_1 = arith.constant 0 : i32
    return %c0_i32, %c0_i32_0 : i32, i32
  }
  func.func @transform_8(%arg0: i32) -> (i32, i32) {
    %c0_i32 = arith.constant 0 : i32
    %c0_i32_0 = arith.constant 0 : i32
    %c0_i32_1 = arith.constant 0 : i32
    return %c0_i32, %c0_i32_0 : i32, i32
  }
  func.func @transform_9(%arg0: i32) -> (i32, i32) {
    %c0_i32 = arith.constant 0 : i32
    %c0_i32_0 = arith.constant 0 : i32
    %c0_i32_1 = arith.constant 0 : i32
    return %c0_i32, %c0_i32_0 : i32, i32
  }
  func.func @transform_10(%arg0: i32) -> (i32, i32, i32) {
    %c0_i32 = arith.constant 0 : i32
    %c0_i32_0 = arith.constant 0 : i32
    %c0_i32_1 = arith.constant 0 : i32
    return %arg0, %c0_i32, %c0_i32_0 : i32, i32, i32
  }
}

</mosaic_0001>

<bundles_post_ra>
// kernel: tile.0
= control target key start
LH: loop header
LB: loop body
LE: loop exit
PB: predicated region body
PF: predicated region fallthrough
CT: control target
= control target key end

     0   :  { %s34_s8 = smov 125   ;;  %s35_s9 = smov 126   ;;  %vm7_vm0 = vcmask 7168   ;;  %s61_s0 = inlined_call_operand.vmem [shape: f32[4,1,1,4], index: 0, kind: input, shape index: {}]   ;;  %s62_s1 = inlined_call_operand.vmem [shape: f32[16,1], index: 1, kind: output, shape index: {}]  }
   0x1   :  { %v4_v0 = vld [vmem:[%s61_s0] sm:$0xf]  ;;  %s33_s0 = smov 127  }
   0x2   :  { %5 = vst [vmem:[#allocation0] sm:$0xf] %v4_v0 }
   0x9   :  { %v9_v1 = vld [vmem:[#allocation0] sm:$0xf]  }
   0xa   :  { %v21_v2 = vld [vmem:[#allocation0] sm:$0xf]   ;;  %10 = vrot.lane.b32.xlu0 %v9_v1, %s33_s0 }
   0xb   :  { %22 = vrot.lane.b32.xlu1 %v21_v2, %s34_s8  ;;  %v15_v3 = vld [vmem:[#allocation0] sm:$0xf]  }
   0xc   :  { %v6_v4 = vld [vmem:[#allocation0] sm:$0xf]  }
   0xd   :  { %8 = vst.msk [vmem:[%s62_s1] ss:$4 sm:$0xf] %vm7_vm0, %v6_v4  }
  0x12   :  { %16 = vrot.lane.b32.xlu0 %v15_v3, %s35_s9 }
  0x7c   :  { %v11_v5 = vpop.permute.xlu0 %10  }
  0x7d   :  { %v23_v6 = vpop.permute.xlu1 %22   ;;  %27 = vst.msk [vmem:[%s62_s1 + $0x1] ss:$4 sm:$0xf] %vm7_vm0, %v11_v5  }
  0x7e   :  { %29 = vst.msk [vmem:[%s62_s1 + $0x3] ss:$4 sm:$0xf] %vm7_vm0, %v23_v6  }
  0x84   :  { %v17_v7 = vpop.permute.xlu0 %16  }
  0x85   :  { %28 = vst.msk [vmem:[%s62_s1 + $0x2] ss:$4 sm:$0xf] %vm7_vm0, %v17_v7  }

// kernel: tile.14
= control target key start
LH: loop header
LB: loop body
LE: loop exit
PB: predicated region body
PF: predicated region fallthrough
CT: control target
= control target key end

     0   :  { %s22_s0 = inlined_call_operand.vmem [shape: f32[4], index: 0, kind: input, shape index: {}]   ;;  %s23_s1 = inlined_call_operand.vmem [shape: f32[4,1,1,4], index: 1, kind: output, shape index: {}]  }
   0x1   :  { %v4_v0 = vld [vmem:[%s22_s0] ss:$0 sm:$0xff] }
   0x2   :  { %5 = vst [vmem:[%s23_s1] sm:$0xf] %v4_v0 }

// kernel: unet_up_pallas.1
= control target key start
LH: loop header
LB: loop body
LE: loop exit
PB: predicated region body
PF: predicated region fallthrough
CT: control target
= control target key end

     0   :  { %s1646_s13 = smov 0   ;;  %s1942_s0 = inlined_call_operand.vmem [shape: f32[2,4,256], index: 0, kind: input, shape index: {}]   ;;  %s1943_s1 = inlined_call_operand.vmem [shape: bf16[9,8,4], index: 1, kind: input, shape index: {}]   ;;  %s1944_s2 = inlined_call_operand.vmem [shape: f32[8,1], index: 2, kind: input, shape index: {}]   ;;  %s1945_s3 = inlined_call_operand.vmem [shape: f32[8,1], index: 3, kind: input, shape index: {}]   ;;  %s1946_s4 = inlined_call_operand.vmem [shape: bf16[9,8,8], index: 4, kind: input, shape index: {}]   ;;  %s1947_s5 = inlined_call_operand.vmem [shape: f32[8,1], index: 5, kind: input, shape index: {}]   ;;  %s1948_s6 = inlined_call_operand.vmem [shape: f32[8,1], index: 6, kind: input, shape index: {}]   ;;  %s1949_s7 = inlined_call_operand.vmem [shape: bf16[16,8], index: 7, kind: input, shape index: {}]   ;;  %s1950_s8 = inlined_call_operand.vmem [shape: f32[16,1], index: 8, kind: input, shape index: {}]   ;;  %s1951_s9 = inlined_call_operand.vmem [shape: f32[16,1], index: 9, kind: input, shape index: {}]   ;;  %s1952_s10 = inlined_call_operand.vmem [shape: f32[2,16,256], index: 10, kind: output, shape index: {}]  }
   0x1 LB: > { %s1480_s14 = sadd.s32 4294967295, %s1579_s13   ;;  %p1484_p0 = scmp.ge.s32.totalorder %s1579_s13, 1  ;;  %s1579_s13 = sphi %s1646_s13, %s20_s13  }
   0x2   : > { %p312_p1 = scmp.lt.s32.totalorder %s1579_s13, 3 }
   0x4   : > { %p313_p2 = pnand %p1484_p0, %p312_p1 }
   0x5   : > { %p350_p3 = scmp.lt.s32.totalorder (!%p313_p2), %s1480_s14, 1  ;;  %s1582_s19 = smov (!%p313_p2), 17  }
   0x6   : > { %316 = sbr.rel (%p313_p2) target bundleno = 1090 (0x442), region = 60  ;;  %s1583_s20 = smov (!%p313_p2), 111  }
   0x7   : > { %s1584_s21 = smov (!%p313_p2), 127   ;;  %s1585_s22 = smov (!%p313_p2), 95  }
   0x8   : > { %s1586_s23 = smov (!%p313_p2), 112   ;;  %s1587_s24 = smov (!%p313_p2), 96  }
   0x9   : > { %s1588_s25 = smov (!%p313_p2), 110   ;;  %s1589_s26 = smov (!%p313_p2), 126  }
   0xa   : > { %s1590_s27 = smov (!%p313_p2), 94  }
   0xb   : > { %vm392_vm0 = vcmask 134144   ;;  %vm394_vm1 = vcmask 273544   ;;  %v1581_v0 = vmov 0   ;;  %s1965_s14 = smov (!%p350_p3, %s1480_s14), 1  ;;  %vm412_vm2 = vcmask 1041544  }
   0xc   : > { %393 = vst.msk [vmem:[#allocation2] sm:$0xf] %vm392_vm0, %v1581_v0  ;;  %1570 = vset.pattern.permute.xlu1 %v1581_v0  ;;  %1571 = vset.pattern.permute.xlu2 %v1581_v0  ;;  %s1549_s15 = sshll.u32 %s1965_s14, 3  ;;  %vm413_vm3 = vcmask 1045508   ;;  %vm408_vm4 = vcmask 138240   ;;  %vm416_vm5 = vcmask 132096  }
   0xd   : > { %395 = vst.msk [vmem:[#allocation2 + $0x8] sm:$0xf] %vm394_vm1, %v1581_v0  ;;  %1572 = vset.pattern.permute.xlu0 %v1581_v0  ;;  %s354_s18 = scalar_lea.vmem %s1942_s0, %s1549_s15  ;;  %vm414_vm6 = vmor %vm413_vm3, %vm412_vm2  ;;  %vm484_vm7 = vcmask 1039360   ;;  %vm445_vm8 = vcmask 1041408   ;;  %v1489_v20 = vld [vmem:[%s1943_s1 + $0x4] sm:$0xf] }
   0xe   : > { %v396_v1 = vld [vmem:[%s354_s18] sm:$0xff]  ;;  %vm441_vm9 = vcmask 31744   ;;  %vm438_vm10 = vcmask 908288   ;;  %v1490_v25 = vld [vmem:[%s1943_s1 + $0x10] sm:$0xf]  ;;  %vm530_vm11 = vcmask 777216  }
   0xf   : > { %398 = vst [vmem:[#allocation1] ss:$2 sm:$0xff] %v396_v1  ;;  %v1495_v47 = vld [vmem:[%s1943_s1 + $0x1c] sm:$0xf]  ;;  %vm580_vm12 = vcmask 916480   ;;  %vm666_vm13 = vcmask 785408  }
  0x10   : > { %v1498_v55 = vld [vmem:[%s1943_s1 + $0xc] sm:$0xf]  ;;  %v571_v63 = vld [vmem:[%s1943_s1] sm:$0xf]  ;;  %vm724_vm14 = vcmask 900096   ;;  %vm1953_vm15 = vcmask 1031168  }
  0x11   : > { %vm814_vm1 = vcmask 769024   ;;  %s1550_s28 = sshll.u32 %s1965_s14, 5 }
  0x12   : > { %s359_s11 = scalar_lea.vmem %s1952_s10, %s1550_s28 }
  0x16   : > { %v399_v2 = vld.sshfl [vmem:[#allocation1] sm:$0xff pattern:$0x75316420]  ;;  %v400_v3 = vld.sshfl [vmem:[#allocation1 + $0x8] sm:$0xff pattern:$0x75316420] }
  0x17   : > { %v403_v4 = vpack.c.bf16 %v400_v3, %v399_v2 }
  0x19   : > { %405 = vrot.lane.b32.xlu0 %v403_v4, %s1582_s19 }
  0x8b   : > { %v406_v5 = vpop.permute.xlu0 %405 }
  0x8c   : > { %v407_v6 = vrot.slane %v406_v5, 4 }
  0x8e   : > { %v409_v7 = vsel %vm408_vm4, %v407_v6, %v406_v5  ;;  %417 = vst.msk [vmem:[#allocation2 + $0x8] sm:$0x3] %vm416_vm5, %v407_v6  ;;  %v1503_v6 = vld [vmem:[%s1943_s1 + $0x18] sm:$0xf] }
  0x8f   : > { %415 = vst.msk [vmem:[#allocation2] sm:$0x33] %vm414_vm6, %v409_v7 }
  0x95   : > { %v419_v13 = vld [vmem:[#allocation2 + $0x8] sm:$0x3] }
  0x96   : > { %v418_v8 = vld [vmem:[#allocation2] sm:$0x33]  ;;  %v428_v14 = vunpack.c.l.b16 %v419_v13 }
  0x97   : > { %v427_v9 = vunpack.c.h.b16 %v418_v8  ;;  %v426_v10 = vunpack.c.l.b16 %v418_v8  ;;  %v570_v28 = vld [vmem:[#allocation2] sm:$0x33]  ;;  %v862_v8 = vld [vmem:[%s1944_s2] sm:$0xff] }
  0x98   : > { %v431_v15 = vpack.c.b16 %v428_v14, %v428_v14  ;;  %v619_v34 = vunpack.c.l.b16 %v570_v28  ;;  %v620_v35 = vunpack.c.h.b16 %v570_v28 }
  0x99   : > { %v430_v11 = vpack.c.b16 %v427_v9, %v427_v9  ;;  %v429_v12 = vpack.c.b16 %v426_v10, %v426_v10  ;;  %v870_v9 = vld [vmem:[%s1945_s3] sm:$0xff] }
  0x9a   : > { %v621_v36 = vpack.c.b16 %v619_v34, %v619_v34  ;;  %v622_v39 = vpack.c.b16 %v620_v35, %v620_v35 }
  0x9b   : > { %434 = vrot.lane.b32.xlu1 %v430_v11, %s1583_s20  ;;  %478 = vrot.lane.b32.xlu2 %v429_v12, %s1584_s21 }
  0x9c   : > { %432 = vrot.lane.b32.xlu0 %v429_v12, %s1583_s20  ;;  %v627_v45 = vsel %vm445_vm8, %v621_v36, 0  ;;  %v630_v46 = vsel %vm445_vm8, %v622_v39, 0 }
  0xa3   : > { %436 = vrot.lane.b32.xlu1 %v431_v15, %s1583_s20  ;;  %480 = vrot.lane.b32.xlu2 %v430_v11, %s1584_s21 }
  0xa4   : > { %482 = vrot.lane.b32.xlu0 %v431_v15, %s1584_s21 }
  0xab   : > { %524 = vrot.lane.b32.xlu1 %v429_v12, %s1585_s22  ;;  %526 = vrot.lane.b32.xlu2 %v430_v11, %s1585_s22 }
  0xac   : > { %528 = vrot.lane.b32.xlu0 %v431_v15, %s1585_s22 }
  0xb3   : > { %574 = vrot.lane.b32.xlu1 %v429_v12, %s1586_s23  ;;  %576 = vrot.lane.b32.xlu2 %v430_v11, %s1586_s23 }
  0xb4   : > { %578 = vrot.lane.b32.xlu0 %v431_v15, %s1586_s23 }
  0xbb   : > { %660 = vrot.lane.b32.xlu1 %v429_v12, %s1587_s24  ;;  %662 = vrot.lane.b32.xlu2 %v430_v11, %s1587_s24 }
  0xbc   : > { %664 = vrot.lane.b32.xlu0 %v431_v15, %s1587_s24 }
  0xc3   : > { %718 = vrot.lane.b32.xlu1 %v429_v12, %s1588_s25  ;;  %720 = vrot.lane.b32.xlu2 %v430_v11, %s1588_s25 }
  0xc4   : > { %722 = vrot.lane.b32.xlu0 %v431_v15, %s1588_s25 }
  0xcb   : > { %762 = vrot.lane.b32.xlu1 %v429_v12, %s1589_s26  ;;  %764 = vrot.lane.b32.xlu2 %v430_v11, %s1589_s26 }
  0xcc   : > { %766 = vrot.lane.b32.xlu0 %v431_v15, %s1589_s26 }
  0xd3   : > { %808 = vrot.lane.b32.xlu1 %v429_v12, %s1590_s27  ;;  %810 = vrot.lane.b32.xlu2 %v430_v11, %s1590_s27 }
  0xd4   : > { %812 = vrot.lane.b32.xlu0 %v431_v15, %s1590_s27 }
  0xdb   : > { %865 = vperm.xlu1 %1570, %v862_v8   ;;  %873 = vperm.xlu2 %1571, %v870_v9  }
  0xf5   : > { %v479_v16 = vpop.permute.xlu2 %478 }
  0xfd   : > { %v481_v17 = vpop.permute.xlu2 %480 }
  0xfe   : > { %v485_v18 = vsel %vm484_vm7, %v479_v16, %v481_v17  ;;  %v1507_v16 = vld [vmem:[%s1943_s1 + $0x14] sm:$0xf] }
  0xff   : > { %v491_v19 = vsel %vm445_vm8, %v485_v18, 0 }
 0x100   : > { %503 = vmatpush.bf16.msra.mxu2 %v491_v19 }
 0x103   : > { %1493 = vmatmul.msk.bf16.vlgmr.msra.gmra.mxu2 %vm441_vm9, %v1489_v20 }
 0x105   : > { %v527_v26 = vpop.permute.xlu2 %526 }
 0x10d   : > { %v435_v21 = vpop.permute.xlu1 %434  ;;  %v577_v37 = vpop.permute.xlu2 %576 }
 0x10e   : > { %v433_v22 = vpop.permute.xlu0 %432 }
 0x10f   : > { %v439_v23 = vsel %vm438_vm10, %v433_v22, %v435_v21 }
 0x110   : > { %v447_v24 = vsel %vm445_vm8, %v439_v23, 0 }
 0x111   : > { %459 = vmatpush.bf16.msra.mxu0 %v447_v24  ;;  %v1506_v24 = vld [vmem:[%s1943_s1 + $0x8] sm:$0xf] }
 0x114   : > { %1491 = vmatmul.msk.bf16.vlgmr.msra.gmra.mxu0 %vm441_vm9, %v1490_v25 }
 0x115   : > { %v437_v27 = vpop.permute.xlu1 %436  ;;  %v663_v51 = vpop.permute.xlu2 %662 }
 0x116   : > { %v483_v29 = vpop.permute.xlu0 %482  ;;  %v440_v30 = vsel %vm438_vm10, %v435_v21, %v437_v27 }
 0x117   : > { %v450_v31 = vsel %vm445_vm8, %v440_v30, 0  ;;  %v486_v32 = vsel %vm484_vm7, %v481_v17, %v483_v29 }
 0x118   : > { %472 = vmatpush.bf16.msra.mxu1 %v450_v31  ;;  %v494_v33 = vsel %vm445_vm8, %v486_v32, 0 }
 0x119   : > { %516 = vmatpush.bf16.msra.mxu3 %v494_v33 }
 0x11b   : > { %1492 = vmatmul.msk.bf16.vlgmr.msra.gmra.mxu1 %vm441_vm9, %v1490_v25  ;;  %v1512_v25 = vld [vmem:[%s1943_s1 + $0x20] sm:$0xf] }
 0x11c   : > { %1494 = vmatmul.msk.bf16.vlgmr.msra.gmra.mxu3 %vm441_vm9, %v1489_v20 }
 0x11d   : > { %v525_v38 = vpop.permute.xlu1 %524  ;;  %v721_v62 = vpop.permute.xlu2 %720 }
 0x11e   : > { %v529_v40 = vpop.permute.xlu0 %528  ;;  %v531_v41 = vsel %vm530_vm11, %v525_v38, %v527_v26 }
 0x11f   : > { %v537_v42 = vsel %vm445_vm8, %v531_v41, 0  ;;  %v532_v43 = vsel %vm530_vm11, %v527_v26, %v529_v40 }
 0x120   : > { %549 = vmatpush.bf16.msrb.mxu0 %v537_v42  ;;  %v540_v44 = vsel %vm445_vm8, %v532_v43, 0 }
 0x121   : > { %562 = vmatpush.bf16.msrb.mxu1 %v540_v44 }
 0x124   : > { %639 = vmatpush.bf16.msra.mxu0 %v627_v45 }
 0x125   : > { %652 = vmatpush.bf16.msra.mxu1 %v630_v46  ;;  %1496 = vmatmul.msk.bf16.vlgmr.msrb.gmra.mxu0 %vm441_vm9, %v1495_v47  ;;  %v575_v48 = vpop.permute.xlu1 %574  ;;  %v765_v7 = vpop.permute.xlu2 %764 }
 0x126   : > { %v579_v49 = vpop.permute.xlu0 %578  ;;  %v581_v50 = vsel %vm580_vm12, %v575_v48, %v577_v37 }
 0x127   : > { %v587_v52 = vsel %vm445_vm8, %v581_v50, 0  ;;  %v582_v53 = vsel %vm580_vm12, %v577_v37, %v579_v49  ;;  %v361_v50 = vlaneseq }
 0x128   : > { %599 = vmatpush.bf16.msrb.mxu2 %v587_v52  ;;  %v590_v54 = vsel %vm445_vm8, %v582_v53, 0 }
 0x129   : > { %612 = vmatpush.bf16.msrb.mxu3 %v590_v54  ;;  %v362_v53 = vand.u32 127, %v361_v50  ;;  %v1386_v50 = vld [vmem:[%s1950_s8 + $0x8] sm:$0xff] }
 0x12b   : > { %1497 = vmatmul.msk.bf16.vlgmr.msrb.gmra.mxu1 %vm441_vm9, %v1495_v47  ;;  %1499 = vmatmul.msk.bf16.vlgmr.msrb.gmra.mxu2 %vm441_vm9, %v1498_v55 }
 0x12c   : > { %1500 = vmatmul.msk.bf16.vlgmr.msrb.gmra.mxu3 %vm441_vm9, %v1498_v55 }
 0x12d   : > { %v661_v56 = vpop.permute.xlu1 %660  ;;  %v811_v17 = vpop.permute.xlu2 %810 }
 0x12e   : > { %v667_v57 = vsel %vm666_vm13, %v661_v56, %v663_v51  ;;  %v665_v58 = vpop.permute.xlu0 %664  ;;  %v368_v56 = vand.u32 15, %v362_v53 }
 0x12f   : > { %v673_v59 = vsel %vm445_vm8, %v667_v57, 0  ;;  %v668_v60 = vsel %vm666_vm13, %v663_v51, %v665_v58  ;;  %v363_v58 = vadd.s32 128, %v362_v53 }
 0x130   : > { %v676_v61 = vsel %vm445_vm8, %v668_v60, 0  ;;  %685 = vmatpush.bf16.msra.mxu2 %v673_v59  ;;  %vm1772_vm2 = vcmp.ge.s32.totalorder %v368_v56, 1  ;;  %vm1778_vm3 = vcmp.le.s32.totalorder %v368_v56, 14 }
 0x131   : > { %698 = vmatpush.bf16.msra.mxu3 %v676_v61 }
 0x135   : > { %1501 = vmatmul.msk.bf16.vlgmr.msra.gmra.mxu0 %vm441_vm9, %v571_v63  ;;  %v719_v0 = vpop.permute.xlu1 %718 }
 0x136   : > { %v725_v1 = vsel %vm724_vm14, %v719_v0, %v721_v62  ;;  %v723_v2 = vpop.permute.xlu0 %722  ;;  %v375_v0 = vand.u32 15, %v363_v58 }
 0x137   : > { %v731_v3 = vsel %vm445_vm8, %v725_v1, 0  ;;  %v726_v4 = vsel %vm724_vm14, %v721_v62, %v723_v2 }
 0x138   : > { %v734_v5 = vsel %vm445_vm8, %v726_v4, 0  ;;  %743 = vmatpush.bf16.msrb.mxu0 %v731_v3  ;;  %vm1782_vm5 = vcmp.ge.s32.totalorder %v375_v0, 1  ;;  %vm1790_vm6 = vcmp.le.s32.totalorder %v375_v0, 14  ;;  %v1551_v4 = vld [vmem:[%s1949_s7] sm:$0xff] }
 0x139   : > { %756 = vmatpush.bf16.msrb.mxu1 %v734_v5 }
 0x13b   : > { %1502 = vmatmul.msk.bf16.vlgmr.msra.gmra.mxu1 %vm441_vm9, %v571_v63  ;;  %1504 = vmatmul.msk.bf16.vlgmr.msra.gmra.mxu2 %vm441_vm9, %v1503_v6 }
 0x13c   : > { %1505 = vmatmul.msk.bf16.vlgmr.msra.gmra.mxu3 %vm441_vm9, %v1503_v6 }
 0x13d   : > { %v763_v10 = vpop.permute.xlu1 %762 }
 0x13e   : > { %v769_v11 = vsel %vm1953_vm15, %v763_v10, %v765_v7  ;;  %v767_v12 = vpop.permute.xlu0 %766 }
 0x13f   : > { %v775_v13 = vsel %vm445_vm8, %v769_v11, 0  ;;  %v770_v14 = vsel %vm1953_vm15, %v765_v7, %v767_v12 }
 0x140   : > { %v778_v15 = vsel %vm445_vm8, %v770_v14, 0  ;;  %787 = vmatpush.bf16.msrb.mxu2 %v775_v13 }
 0x141   : > { %800 = vmatpush.bf16.msrb.mxu3 %v778_v15 }
 0x145   : > { %1508 = vmatmul.msk.bf16.vlgmr.msrb.gmra.mxu0 %vm441_vm9, %v1507_v16  ;;  %v809_v18 = vpop.permute.xlu1 %808 }
 0x146   : > { %v815_v19 = vsel %vm814_vm1, %v809_v18, %v811_v17  ;;  %v813_v20 = vpop.permute.xlu0 %812 }
 0x147   : > { %v821_v21 = vsel %vm445_vm8, %v815_v19, 0  ;;  %v816_v22 = vsel %vm814_vm1, %v811_v17, %v813_v20 }
 0x148   : > { %v824_v23 = vsel %vm445_vm8, %v816_v22, 0  ;;  %833 = vmatpush.bf16.msra.mxu0 %v821_v21  ;;  %vm888_vm8 = vcmask 1043592  }
 0x149   : > { %846 = vmatpush.bf16.msra.mxu1 %v824_v23 }
 0x14b   : > { %1509 = vmatmul.msk.bf16.vlgmr.msrb.gmra.mxu1 %vm441_vm9, %v1507_v16  ;;  %1510 = vmatmul.msk.bf16.vlgmr.msrb.gmra.mxu2 %vm441_vm9, %v1506_v24 }
 0x14c   : > { %1511 = vmatmul.msk.bf16.vlgmr.msrb.gmra.mxu3 %vm441_vm9, %v1506_v24 }
 0x14d   : > { %v866_v17 = vpop.permute.xlu1 %865 }
 0x155   : > { %1513 = vmatmul.msk.bf16.vlgmr.msra.gmra.mxu0 %vm441_vm9, %v1512_v25 }
 0x15b   : > { %1514 = vmatmul.msk.bf16.vlgmr.msra.gmra.mxu1 %vm441_vm9, %v1512_v25  ;;  %vm889_vm9 = vcmask 1047556  }
 0x15c   : > { %vm890_vm15 = vmor %vm889_vm9, %vm888_vm8 }
 0x186   : > { %v505_v26 = vpop.f32.mrf.mxu2 }
 0x18e   : > { %v507_v27 = vpop.f32.mrf.mxu2 }
 0x191   : > { %v461_v28 = vpop.f32.mrf.mxu0 }
 0x192   : > { %v506_v29 = vadd.f32 %v505_v26, %v461_v28  ;;  %v874_v26 = vpop.permute.xlu2 %873 }
 0x198   : > { %v474_v30 = vpop.f32.mrf.mxu1 }
 0x199   : > { %v463_v31 = vpop.f32.mrf.mxu0 }
 0x19f   : > { %v518_v32 = vpop.f32.mrf.mxu3 }
 0x1a0   : > { %v476_v33 = vpop.f32.mrf.mxu1  ;;  %v519_v12 = vadd.f32 %v518_v32, %v474_v30 }
 0x1a2   : > { %v551_v34 = vpop.f32.mrf.mxu0 }
 0x1a3   : > { %v568_v6 = vadd.f32 %v551_v34, %v506_v29 }
 0x1a7   : > { %v520_v35 = vpop.f32.mrf.mxu3 }
 0x1a8   : > { %v564_v36 = vpop.f32.mrf.mxu1 }
 0x1a9   : > { %v569_v19 = vadd.f32 %v564_v36, %v519_v12 }
 0x1aa   : > { %v553_v37 = vpop.f32.mrf.mxu0 }
 0x1ae   : > { %v601_v38 = vpop.f32.mrf.mxu2 }
 0x1af   : > { %v614_v39 = vpop.f32.mrf.mxu3 }
 0x1b0   : > { %v566_v40 = vpop.f32.mrf.mxu1 }
 0x1b2   : > { %v641_v41 = vpop.f32.mrf.mxu0 }
 0x1b3   : > { %v642_v57 = vadd.f32 %v641_v41, %v601_v38 }
 0x1b6   : > { %v603_v42 = vpop.f32.mrf.mxu2 }
 0x1b7   : > { %v616_v43 = vpop.f32.mrf.mxu3 }
 0x1b8   : > { %v654_v44 = vpop.f32.mrf.mxu1 }
 0x1b9   : > { %v655_v2 = vadd.f32 %v654_v44, %v614_v39 }
 0x1ba   : > { %v643_v45 = vpop.f32.mrf.mxu0 }
 0x1be   : > { %v687_v46 = vpop.f32.mrf.mxu2 }
 0x1bf   : > { %v700_v47 = vpop.f32.mrf.mxu3  ;;  %v704_v59 = vadd.f32 %v687_v46, %v642_v57 }
 0x1c0   : > { %v656_v48 = vpop.f32.mrf.mxu1  ;;  %v705_v8 = vadd.f32 %v700_v47, %v655_v2  ;;  %v1329_v47 = vld [vmem:[%s1948_s6] sm:$0xff] }
 0x1c1   : > { %v710_v3 = vsel %vm1772_vm2, %v704_v59, 0.0  ;;  %v1321_v48 = vld [vmem:[%s1947_s5] sm:$0xff] }
 0x1c2   : > { %v745_v49 = vpop.f32.mrf.mxu0  ;;  %v712_v9 = vadd.f32 %v710_v3, %v568_v6  ;;  %v711_v15 = vsel %vm1782_vm5, %v705_v8, 0.0 }
 0x1c3   : > { %v713_v24 = vadd.f32 %v711_v15, %v569_v19 }
 0x1c6   : > { %v689_v51 = vpop.f32.mrf.mxu2 }
 0x1c7   : > { %v702_v52 = vpop.f32.mrf.mxu3  ;;  %v1402_v51 = vld [vmem:[%s1951_s9 + $0x8] sm:$0xff] }
 0x1c8   : > { %v758_v54 = vpop.f32.mrf.mxu1 }
 0x1ca   : > { %v747_v55 = vpop.f32.mrf.mxu0 }
 0x1ce   : > { %v789_v61 = vpop.f32.mrf.mxu2 }
 0x1cf   : > { %v790_v62 = vadd.f32 %v789_v61, %v745_v49  ;;  %v802_v63 = vpop.f32.mrf.mxu3  ;;  %v1401_v49 = vld [vmem:[%s1951_s9] sm:$0xff]  ;;  %v1516_v61 = vld [vmem:[%s1946_s4 + $0x10] sm:$0xf] }
 0x1d0   : > { %v760_v1 = vpop.f32.mrf.mxu1  ;;  %v803_v16 = vadd.f32 %v802_v63, %v758_v54 }
 0x1d2   : > { %v835_v5 = vpop.f32.mrf.mxu0 }
 0x1d3   : > { %v852_v7 = vadd.f32 %v835_v5, %v790_v62 }
 0x1d5   : > { %v858_v11 = vsel %vm1778_vm3, %v852_v7, 0.0 }
 0x1d6   : > { %v860_v13 = vadd.f32 %v858_v11, %v712_v9  ;;  %v791_v14 = vpop.f32.mrf.mxu2 }
 0x1d7   : > { %v804_v18 = vpop.f32.mrf.mxu3 }
 0x1d8   : > { %v848_v21 = vpop.f32.mrf.mxu1  ;;  %v868_v25 = vmul.f32 %v866_v17, %v860_v13 }
 0x1d9   : > { %v853_v23 = vadd.f32 %v848_v21, %v803_v16  ;;  %v1515_v16 = vld [vmem:[%s1946_s4 + $0x4] sm:$0xf] }
 0x1da   : > { %v837_v22 = vpop.f32.mrf.mxu0  ;;  %v876_v29 = vadd.f32 %v874_v26, %v868_v25 }
 0x1db   : > { %v859_v27 = vsel %vm1790_vm6, %v853_v23, 0.0 }
 0x1dc   : > { %v861_v28 = vadd.f32 %v859_v27, %v713_v24  ;;  %v878_v33 = vmax.f32 %v876_v29, 0.0 }
 0x1de   : > { %v869_v30 = vmul.f32 %v866_v17, %v861_v28  ;;  %v1521_v17 = vld [vmem:[%s1946_s4 + $0x1c] sm:$0xf] }
 0x1e0   : > { %v850_v31 = vpop.f32.mrf.mxu1  ;;  %v877_v32 = vadd.f32 %v874_v26, %v869_v30 }
 0x1e2   : > { %v879_v34 = vmax.f32 %v877_v32, 0.0  ;;  %v1524_v32 = vld [vmem:[%s1946_s4 + $0xc] sm:$0xf] }
 0x1e4   : > { %v880_v35 = vpack.c.bf16 %v879_v34, %v878_v33  ;;  %v1043_v33 = vld [vmem:[%s1946_s4] sm:$0xf] }
 0x1e6   : > { %882 = vrot.lane.b32.xlu0 %v880_v35, %s1582_s19 }
 0x258   : > { %v883_v36 = vpop.permute.xlu0 %882 }
 0x259   : > { %v884_v37 = vrot.slane %v883_v36, 4 }
 0x25b   : > { %v885_v38 = vsel %vm408_vm4, %v884_v37, %v883_v36  ;;  %892 = vst.msk [vmem:[#allocation2 + $0x8] sm:$0xf] %vm392_vm0, %v884_v37  ;;  %vm919_vm0 = vcmask 1043456   ;;  %vm915_vm4 = vcmask 64512  }
 0x25c   : > { %891 = vst.msk [vmem:[#allocation2] sm:$0xff] %vm890_vm15, %v885_v38 }
 0x262   : > { %v894_v39 = vld [vmem:[#allocation2 + $0x8] sm:$0xf] }
 0x263   : > { %v903_v40 = vunpack.c.l.b16 %v894_v39  ;;  %v893_v41 = vld [vmem:[#allocation2] sm:$0xff] }
 0x264   : > { %v902_v42 = vunpack.c.h.b16 %v893_v41  ;;  %v901_v43 = vunpack.c.l.b16 %v893_v41 }
 0x265   : > { %v906_v44 = vpack.c.b16 %v903_v40, %v903_v40 }
 0x266   : > { %v905_v45 = vpack.c.b16 %v902_v42, %v902_v42  ;;  %v904_v46 = vpack.c.b16 %v901_v43, %v901_v43 }
 0x267   : > { %911 = vrot.lane.b32.xlu0 %v906_v44, %s1583_s20 }
 0x268   : > { %909 = vrot.lane.b32.xlu2 %v905_v45, %s1583_s20  ;;  %907 = vrot.lane.b32.xlu1 %v904_v46, %s1583_s20  ;;  %v1101_v6 = vsel %vm919_vm0, %v905_v45, 0  ;;  %v1098_v7 = vsel %vm919_vm0, %v904_v46, 0 }
 0x26f   : > { %1001 = vrot.lane.b32.xlu0 %v906_v44, %s1585_s22 }
 0x270   : > { %999 = vrot.lane.b32.xlu2 %v905_v45, %s1585_s22  ;;  %997 = vrot.lane.b32.xlu1 %v904_v46, %s1585_s22 }
 0x277   : > { %956 = vrot.lane.b32.xlu0 %v906_v44, %s1584_s21 }
 0x278   : > { %954 = vrot.lane.b32.xlu2 %v905_v45, %s1584_s21  ;;  %952 = vrot.lane.b32.xlu1 %v904_v46, %s1584_s21 }
 0x27f   : > { %1050 = vrot.lane.b32.xlu0 %v906_v44, %s1586_s23 }
 0x280   : > { %1048 = vrot.lane.b32.xlu2 %v905_v45, %s1586_s23  ;;  %1046 = vrot.lane.b32.xlu1 %v904_v46, %s1586_s23 }
 0x287   : > { %1188 = vrot.lane.b32.xlu0 %v906_v44, %s1588_s25 }
 0x288   : > { %1186 = vrot.lane.b32.xlu2 %v905_v45, %s1588_s25  ;;  %1184 = vrot.lane.b32.xlu1 %v904_v46, %s1588_s25 }
 0x28f   : > { %1135 = vrot.lane.b32.xlu0 %v906_v44, %s1587_s24 }
 0x290   : > { %1133 = vrot.lane.b32.xlu2 %v905_v45, %s1587_s24  ;;  %1131 = vrot.lane.b32.xlu1 %v904_v46, %s1587_s24 }
 0x297   : > { %1276 = vrot.lane.b32.xlu0 %v906_v44, %s1590_s27 }
 0x298   : > { %1274 = vrot.lane.b32.xlu2 %v905_v45, %s1590_s27  ;;  %1272 = vrot.lane.b32.xlu1 %v904_v46, %s1590_s27 }
 0x29f   : > { %1231 = vrot.lane.b32.xlu0 %v906_v44, %s1589_s26 }
 0x2a0   : > { %1229 = vrot.lane.b32.xlu2 %v905_v45, %s1589_s26  ;;  %1227 = vrot.lane.b32.xlu1 %v904_v46, %s1589_s26 }
 0x2a8   : > { %1332 = vperm.xlu2 %1571, %v1329_v47   ;;  %1324 = vperm.xlu1 %1570, %v1321_v48   ;;  %v1529_v48 = vld [vmem:[%s1946_s4 + $0x18] sm:$0xf] }
 0x2b0   : > { %1405 = vperm.xlu2 %1571, %v1401_v49   ;;  %1394 = vperm.xlu1 %1570, %v1386_v50   ;;  %v1533_v49 = vld [vmem:[%s1946_s4 + $0x14] sm:$0xf] }
 0x2b8   : > { %1410 = vperm.xlu1 %1570, %v1402_v51  }
 0x2c2   : > { %v910_v52 = vpop.permute.xlu2 %909 }
 0x2ca   : > { %v1000_v53 = vpop.permute.xlu2 %999 }
 0x2d2   : > { %v955_v62 = vpop.permute.xlu2 %954 }
 0x2d9   : > { %v912_v54 = vpop.permute.xlu0 %911 }
 0x2da   : > { %v914_v55 = vsel %vm438_vm10, %v910_v52, %v912_v54  ;;  %v908_v56 = vpop.permute.xlu1 %907  ;;  %v1049_v8 = vpop.permute.xlu2 %1048 }
 0x2db   : > { %v924_v57 = vsel %vm919_vm0, %v914_v55, 0  ;;  %v913_v58 = vsel %vm438_vm10, %v908_v56, %v910_v52 }
 0x2dc   : > { %v921_v59 = vsel %vm919_vm0, %v913_v58, 0  ;;  %946 = vmatpush.bf16.msra.mxu3 %v924_v57  ;;  %v1532_v57 = vld [vmem:[%s1946_s4 + $0x8] sm:$0xf]  ;;  %v1538_v58 = vld [vmem:[%s1946_s4 + $0x20] sm:$0xf] }
 0x2dd   : > { %933 = vmatpush.bf16.msra.mxu2 %v921_v59 }
 0x2df   : > { %1518 = vmatmul.msk.bf16.vlgmr.msra.gmra.mxu3 %vm915_vm4, %v1516_v61 }
 0x2e0   : > { %1517 = vmatmul.msk.bf16.vlgmr.msra.gmra.mxu2 %vm915_vm4, %v1516_v61 }
 0x2e1   : > { %v1002_v63 = vpop.permute.xlu0 %1001 }
 0x2e2   : > { %v1004_v0 = vsel %vm530_vm11, %v1000_v53, %v1002_v63  ;;  %v998_v1 = vpop.permute.xlu1 %997  ;;  %v1187_v22 = vpop.permute.xlu2 %1186 }
 0x2e3   : > { %v1012_v2 = vsel %vm919_vm0, %v1004_v0, 0  ;;  %v1003_v3 = vsel %vm530_vm11, %v998_v1, %v1000_v53 }
 0x2e4   : > { %v1009_v5 = vsel %vm919_vm0, %v1003_v3, 0  ;;  %1034 = vmatpush.bf16.msrb.mxu3 %v1012_v2 }
 0x2e5   : > { %1021 = vmatpush.bf16.msrb.mxu2 %v1009_v5 }
 0x2e8   : > { %1123 = vmatpush.bf16.msra.mxu3 %v1101_v6 }
 0x2e9   : > { %1110 = vmatpush.bf16.msra.mxu2 %v1098_v7  ;;  %v957_v9 = vpop.permute.xlu0 %956 }
 0x2ea   : > { %v959_v11 = vsel %vm484_vm7, %v955_v62, %v957_v9  ;;  %v953_v12 = vpop.permute.xlu1 %952  ;;  %v1134_v34 = vpop.permute.xlu2 %1133 }
 0x2eb   : > { %v967_v13 = vsel %vm919_vm0, %v959_v11, 0  ;;  %v958_v14 = vsel %vm484_vm7, %v953_v12, %v955_v62  ;;  %vm1962_vm7 = vcmask 1031168  }
 0x2ec   : > { %v964_v15 = vsel %vm919_vm0, %v958_v14, 0  ;;  %989 = vmatpush.bf16.msrb.mxu1 %v967_v13  ;;  %vm1963_vm10 = vmmov %vm1962_vm7 }
 0x2ed   : > { %976 = vmatpush.bf16.msrb.mxu0 %v964_v15 }
 0x2ef   : > { %1520 = vmatmul.msk.bf16.vlgmr.msrb.gmra.mxu1 %vm915_vm4, %v1515_v16  ;;  %1523 = vmatmul.msk.bf16.vlgmr.msrb.gmra.mxu3 %vm915_vm4, %v1521_v17 }
 0x2f0   : > { %1519 = vmatmul.msk.bf16.vlgmr.msrb.gmra.mxu0 %vm915_vm4, %v1515_v16  ;;  %1522 = vmatmul.msk.bf16.vlgmr.msrb.gmra.mxu2 %vm915_vm4, %v1521_v17 }
 0x2f1   : > { %v1051_v18 = vpop.permute.xlu0 %1050 }
 0x2f2   : > { %v1053_v19 = vsel %vm580_vm12, %v1049_v8, %v1051_v18  ;;  %v1047_v21 = vpop.permute.xlu1 %1046  ;;  %v1275_v41 = vpop.permute.xlu2 %1274 }
 0x2f3   : > { %v1061_v23 = vsel %vm919_vm0, %v1053_v19, 0  ;;  %v1052_v24 = vsel %vm580_vm12, %v1047_v21, %v1049_v8 }
 0x2f4   : > { %v1058_v25 = vsel %vm919_vm0, %v1052_v24, 0  ;;  %1083 = vmatpush.bf16.msra.mxu1 %v1061_v23 }
 0x2f5   : > { %1070 = vmatpush.bf16.msra.mxu0 %v1058_v25  ;;  %v1385_v25 = vld [vmem:[%s1950_s8] sm:$0xff] }
 0x2f6   : > { %1389 = vperm.xlu0 %1572, %v1385_v25  }
 0x2f9   : > { %v1189_v26 = vpop.permute.xlu0 %1188 }
 0x2fa   : > { %v1191_v27 = vsel %vm724_vm14, %v1187_v22, %v1189_v26  ;;  %v1185_v28 = vpop.permute.xlu1 %1184  ;;  %v1230_v50 = vpop.permute.xlu2 %1229 }
 0x2fb   : > { %v1199_v29 = vsel %vm919_vm0, %v1191_v27, 0  ;;  %v1190_v30 = vsel %vm724_vm14, %v1185_v28, %v1187_v22 }
 0x2fc   : > { %v1196_v31 = vsel %vm919_vm0, %v1190_v30, 0  ;;  %1221 = vmatpush.bf16.msrb.mxu3 %v1199_v29 }
 0x2fd   : > { %1208 = vmatpush.bf16.msrb.mxu2 %v1196_v31 }
 0x2ff   : > { %1526 = vmatmul.msk.bf16.vlgmr.msra.gmra.mxu1 %vm915_vm4, %v1524_v32  ;;  %1528 = vmatmul.msk.bf16.vlgmr.msra.gmra.mxu3 %vm915_vm4, %v1043_v33 }
 0x300   : > { %1525 = vmatmul.msk.bf16.vlgmr.msra.gmra.mxu0 %vm915_vm4, %v1524_v32  ;;  %1527 = vmatmul.msk.bf16.vlgmr.msra.gmra.mxu2 %vm915_vm4, %v1043_v33 }
 0x301   : > { %v1136_v35 = vpop.permute.xlu0 %1135 }
 0x302   : > { %v1138_v36 = vsel %vm666_vm13, %v1134_v34, %v1136_v35  ;;  %v1132_v37 = vpop.permute.xlu1 %1131 }
 0x303   : > { %v1146_v38 = vsel %vm919_vm0, %v1138_v36, 0  ;;  %v1137_v39 = vsel %vm666_vm13, %v1132_v37, %v1134_v34 }
 0x304   : > { %v1143_v40 = vsel %vm919_vm0, %v1137_v39, 0  ;;  %1168 = vmatpush.bf16.msrb.mxu1 %v1146_v38 }
 0x305   : > { %1155 = vmatpush.bf16.msrb.mxu0 %v1143_v40 }
 0x309   : > { %v1277_v42 = vpop.permute.xlu0 %1276 }
 0x30a   : > { %v1279_v43 = vsel %vm814_vm1, %v1275_v41, %v1277_v42  ;;  %v1273_v44 = vpop.permute.xlu1 %1272 }
 0x30b   : > { %v1287_v45 = vsel %vm919_vm0, %v1279_v43, 0  ;;  %v1278_v46 = vsel %vm814_vm1, %v1273_v44, %v1275_v41 }
 0x30c   : > { %v1284_v47 = vsel %vm919_vm0, %v1278_v46, 0  ;;  %1309 = vmatpush.bf16.msra.mxu3 %v1287_v45 }
 0x30d   : > { %1296 = vmatpush.bf16.msra.mxu2 %v1284_v47 }
 0x30f   : > { %1531 = vmatmul.msk.bf16.vlgmr.msrb.gmra.mxu1 %vm915_vm4, %v1529_v48  ;;  %1535 = vmatmul.msk.bf16.vlgmr.msrb.gmra.mxu3 %vm915_vm4, %v1533_v49 }
 0x310   : > { %1530 = vmatmul.msk.bf16.vlgmr.msrb.gmra.mxu0 %vm915_vm4, %v1529_v48  ;;  %1534 = vmatmul.msk.bf16.vlgmr.msrb.gmra.mxu2 %vm915_vm4, %v1533_v49 }
 0x311   : > { %v1232_v51 = vpop.permute.xlu0 %1231 }
 0x312   : > { %v1234_v52 = vsel %vm1962_vm7, %v1230_v50, %v1232_v51  ;;  %v1228_v53 = vpop.permute.xlu1 %1227 }
 0x313   : > { %v1242_v54 = vsel %vm919_vm0, %v1234_v52, 0  ;;  %v1233_v55 = vsel %vm1963_vm10, %v1228_v53, %v1230_v50 }
 0x314   : > { %v1239_v56 = vsel %vm919_vm0, %v1233_v55, 0  ;;  %1264 = vmatpush.bf16.msra.mxu1 %v1242_v54  ;;  %v1333_v54 = vpop.permute.xlu2 %1332 }
 0x315   : > { %1251 = vmatpush.bf16.msra.mxu0 %v1239_v56 }
 0x31a   : > { %v1325_v52 = vpop.permute.xlu1 %1324 }
 0x31f   : > { %1537 = vmatmul.msk.bf16.vlgmr.msra.gmra.mxu1 %vm915_vm4, %v1532_v57  ;;  %1540 = vmatmul.msk.bf16.vlgmr.msra.gmra.mxu3 %vm915_vm4, %v1538_v58 }
 0x320   : > { %1536 = vmatmul.msk.bf16.vlgmr.msra.gmra.mxu0 %vm915_vm4, %v1532_v57  ;;  %1539 = vmatmul.msk.bf16.vlgmr.msra.gmra.mxu2 %vm915_vm4, %v1538_v58 }
 0x362   : > { %v948_v59 = vpop.f32.mrf.mxu3 }
 0x363   : > { %v935_v61 = vpop.f32.mrf.mxu2 }
 0x36a   : > { %v950_v62 = vpop.f32.mrf.mxu3 }
 0x36b   : > { %v937_v63 = vpop.f32.mrf.mxu2 }
 0x36c   : > { %v991_v0 = vpop.f32.mrf.mxu1 }
 0x36d   : > { %v978_v1 = vpop.f32.mrf.mxu0  ;;  %v992_v34 = vadd.f32 %v991_v0, %v948_v59 }
 0x36e   : > { %v979_v35 = vadd.f32 %v978_v1, %v935_v61 }
 0x372   : > { %v1036_v2 = vpop.f32.mrf.mxu3 }
 0x373   : > { %v1023_v3 = vpop.f32.mrf.mxu2  ;;  %v1041_v38 = vadd.f32 %v1036_v2, %v992_v34  ;;  %v1390_v2 = vpop.permute.xlu0 %1389 }
 0x374   : > { %v993_v5 = vpop.f32.mrf.mxu1  ;;  %v1040_v42 = vadd.f32 %v1023_v3, %v979_v35  ;;  %v1395_v3 = vpop.permute.xlu1 %1394 }
 0x375   : > { %v980_v6 = vpop.f32.mrf.mxu0 }
 0x37a   : > { %v1038_v7 = vpop.f32.mrf.mxu3 }
 0x37b   : > { %v1025_v8 = vpop.f32.mrf.mxu2 }
 0x37c   : > { %v1085_v9 = vpop.f32.mrf.mxu1  ;;  %v1406_v8 = vpop.permute.xlu2 %1405 }
 0x37d   : > { %v1072_v11 = vpop.f32.mrf.mxu0 }
 0x382   : > { %v1125_v12 = vpop.f32.mrf.mxu3 }
 0x383   : > { %v1112_v13 = vpop.f32.mrf.mxu2  ;;  %v1126_v27 = vadd.f32 %v1125_v12, %v1085_v9 }
 0x384   : > { %v1087_v14 = vpop.f32.mrf.mxu1  ;;  %v1113_v29 = vadd.f32 %v1112_v13, %v1072_v11 }
 0x385   : > { %v1074_v15 = vpop.f32.mrf.mxu0 }
 0x38a   : > { %v1127_v16 = vpop.f32.mrf.mxu3 }
 0x38b   : > { %v1114_v17 = vpop.f32.mrf.mxu2 }
 0x38c   : > { %v1170_v18 = vpop.f32.mrf.mxu1 }
 0x38d   : > { %v1157_v19 = vpop.f32.mrf.mxu0  ;;  %v1175_v31 = vadd.f32 %v1170_v18, %v1126_v27  ;;  %v1411_v18 = vpop.permute.xlu1 %1410 }
 0x38e   : > { %v1174_v33 = vadd.f32 %v1157_v19, %v1113_v29 }
 0x38f   : > { %v1177_v36 = vsel %vm1782_vm5, %v1175_v31, 0.0 }
 0x390   : > { %v1176_v39 = vsel %vm1772_vm2, %v1174_v33, 0.0  ;;  %v1179_v45 = vadd.f32 %v1177_v36, %v1041_v38 }
 0x391   : > { %v1178_v48 = vadd.f32 %v1176_v39, %v1040_v42 }
 0x392   : > { %v1223_v21 = vpop.f32.mrf.mxu3 }
 0x393   : > { %v1210_v22 = vpop.f32.mrf.mxu2 }
 0x394   : > { %v1172_v23 = vpop.f32.mrf.mxu1 }
 0x395   : > { %v1159_v24 = vpop.f32.mrf.mxu0 }
 0x39a   : > { %v1225_v26 = vpop.f32.mrf.mxu3 }
 0x39b   : > { %v1212_v28 = vpop.f32.mrf.mxu2 }
 0x39c   : > { %v1266_v30 = vpop.f32.mrf.mxu1 }
 0x39d   : > { %v1253_v32 = vpop.f32.mrf.mxu0  ;;  %v1267_v37 = vadd.f32 %v1266_v30, %v1223_v21 }
 0x39e   : > { %v1254_v40 = vadd.f32 %v1253_v32, %v1210_v22 }
 0x3a2   : > { %v1311_v41 = vpop.f32.mrf.mxu3 }
 0x3a3   : > { %v1316_v43 = vadd.f32 %v1311_v41, %v1267_v37  ;;  %v1298_v44 = vpop.f32.mrf.mxu2 }
 0x3a4   : > { %v1315_v46 = vadd.f32 %v1298_v44, %v1254_v40  ;;  %v1268_v47 = vpop.f32.mrf.mxu1 }
 0x3a5   : > { %v1318_v49 = vsel %vm1790_vm6, %v1316_v43, 0.0  ;;  %v1255_v50 = vpop.f32.mrf.mxu0 }
 0x3a6   : > { %v1320_v10 = vadd.f32 %v1318_v49, %v1179_v45  ;;  %v1317_v51 = vsel %vm1778_vm3, %v1315_v46, 0.0 }
 0x3a7   : > { %v1319_v60 = vadd.f32 %v1317_v51, %v1178_v48 }
 0x3a8   : > { %v1328_v53 = vmul.f32 %v1325_v52, %v1320_v10 }
 0x3a9   : > { %v1327_v55 = vmul.f32 %v1325_v52, %v1319_v60 }
 0x3aa   : > { %v1313_v56 = vpop.f32.mrf.mxu3  ;;  %v1336_v57 = vadd.f32 %v1333_v54, %v1328_v53 }
 0x3ab   : > { %v1300_v58 = vpop.f32.mrf.mxu2  ;;  %v1335_v59 = vadd.f32 %v1333_v54, %v1327_v55 }
 0x3ac   : > { %v1338_v61 = vmax.f32 %v1336_v57, 0.0 }
 0x3ad   : > { %v1337_v62 = vmax.f32 %v1335_v59, 0.0 }
 0x3ae   : > { %v1342_v63 = vpack.c.bf16 %v1338_v61, %v1338_v61 }
 0x3af   : > { %v1341_v20 = vpack.c.bf16 %v1337_v62, %v1337_v62 }
 0x3b0   : > { %v1355_v0 = vsel %vm919_vm0, %v1342_v63, 0 }
 0x3b1   : > { %1378 = vmatpush.bf16.msrb.mxu1 %v1355_v0  ;;  %v1352_v1 = vsel %vm919_vm0, %v1341_v20, 0 }
 0x3b2   : > { %1364 = vmatpush.bf16.msrb.mxu0 %v1352_v1 }
 0x3b4   : > { %1546 = vmatmul.msk.bf16.vlgmr.msrb.gmra.mxu1 %vm915_vm4, %v1551_v4 }
 0x3b5   : > { %1545 = vmatmul.msk.bf16.vlgmr.msrb.gmra.mxu0 %vm915_vm4, %v1551_v4 }
 0x431   : > { %v1380_v5 = vpop.f32.mrf.mxu1 }
 0x432   : > { %v1398_v6 = vmul.f32 %v1390_v2, %v1380_v5  ;;  %v1366_v7 = vpop.f32.mrf.mxu0 }
 0x433   : > { %v1397_v9 = vmul.f32 %v1390_v2, %v1366_v7 }
 0x434   : > { %v1414_v11 = vadd.f32 %v1406_v8, %v1398_v6 }
 0x435   : > { %v1413_v12 = vadd.f32 %v1406_v8, %v1397_v9 }
 0x436   : > { %v1418_v13 = vmax.f32 %v1414_v11, 0.0 }
 0x437   : > { %v1417_v14 = vmax.f32 %v1413_v12, 0.0 }
 0x438   : > { %1422 = vst [vmem:[%s359_s11 + $0x8] sm:$0xff] %v1418_v13 }
 0x439   : > { %1421 = vst [vmem:[%s359_s11] sm:$0xff] %v1417_v14  ;;  %v1382_v15 = vpop.f32.mrf.mxu1 }
 0x43a   : > { %v1400_v16 = vmul.f32 %v1395_v3, %v1382_v15  ;;  %v1368_v17 = vpop.f32.mrf.mxu0 }
 0x43b   : > { %v1399_v19 = vmul.f32 %v1395_v3, %v1368_v17 }
 0x43c   : > { %v1416_v21 = vadd.f32 %v1411_v18, %v1400_v16 }
 0x43d   : > { %v1415_v22 = vadd.f32 %v1411_v18, %v1399_v19 }
 0x43e   : > { %v1420_v23 = vmax.f32 %v1416_v21, 0.0 }
 0x43f   : > { %v1419_v24 = vmax.f32 %v1415_v22, 0.0 }
 0x440   : > { %1424 = vst [vmem:[%s359_s11 + $0x18] sm:$0xff] %v1420_v23 }
 0x441   : > { %1423 = vst [vmem:[%s359_s11 + $0x10] sm:$0xff] %v1419_v24 }
 0x442 PF: > { %s20_s13 = sadd.s32 1, %s1579_s13  }
 0x443   : > { %p17_p4 = scmp.ge.s32.totalorder %s20_s13, 4  }
 0x445   :  { %19 = sbr.rel (!%p17_p4) target bundleno = 1 (0x1), region = 106 }

</bundles_post_ra>
